<compile_context>
chip_gen: v7x
topology: tpu7x:2x2x1
jax: 0.10.0
libtpu: 0.0.40
codegen_flags: <defaults>
</compile_context>

<pallas_src>
import jax
import jax.numpy as jnp
from jax.experimental import pallas as pl
from jax.experimental.pallas import tpu as pltpu


# ----------------------------------------------------------------------------
# Per-generation VMEM budgeting + row-tile selection (static, shape-only)
# ----------------------------------------------------------------------------
def _vmem_limits():
    """Returns (vmem_limit_bytes, per-tile footprint budget)."""
    limit, budget = 48 * 1024 * 1024, 20 * 1024 * 1024        # safe on v7x (64 MiB VMEM)
    try:
        cap = pltpu.get_tpu_info().vmem_capacity_bytes
        if cap is not None and cap >= 120 * 1024 * 1024:      # v5e / v6e: 128 MiB VMEM
            limit, budget = 100 * 1024 * 1024, 40 * 1024 * 1024
    except Exception:
        pass
    return limit, budget


def _choose_row_tile(H, N, est, budget):
    """Largest divisor of H whose estimated VMEM footprint fits `budget`.

    Prefers an even total grid-point count when the best pick would leave an
    odd (tiny) grid - v7x has 2 TensorCores.  Falls back to th=1 (always
    correct, always fits) so prime / odd H can never blow the VMEM limit.
    """
    divs = [d for d in range(H, 0, -1) if H % d == 0 and est(d) <= budget]
    if not divs:
        return 1
    best = divs[0]
    if (N * (H // best)) % 2 == 1:
        for d in divs:
            if (H // d) % 2 == 0:
                return d
    return best


def _row_tile_for_upsample(H, W, C, itemsize, budget, N):
    # in (x2 buf) + out (4x, x2 buf) + lane-duplicated temp  ~= 13 * tile bytes
    return _choose_row_tile(H, N, lambda th: 13 * th * W * C * itemsize, budget)


def _row_tile_for_conv(H, W, Cin, Cout, in_isz, out_isz, budget, N):
    def est(th):
        in_blocks = 2 * th * W * Cin * in_isz + 4 * W * Cin * in_isz   # main + halo rows, x2 buf
        w_blocks = 2 * 16 * Cin * Cout * 2 + 2 * Cout * 4              # folded bf16 weights + bias, x2 buf
        out_block = 2 * 4 * th * W * Cout * out_isz                    # (th,2,W,2Co) block, x2 buf
        temps = ((th + 2) * (W + 2) * Cin * 2                          # zero-bordered tile (bf16)
                 + 2 * th * W * 4 * Cin * 2                            # live phase-LHS (bf16)
                 + 2 * th * W * Cout * 4                               # f32 accumulators
                 + th * W * 2 * Cout * out_isz)                        # one row-phase output half
        return in_blocks + w_blocks + out_block + temps
    return _choose_row_tile(H, N, est, budget)


# ----------------------------------------------------------------------------
# Kernel 1: nearest-neighbor 2x upsample.
# Output produced as (N, H, 2, W, 2C); reshape to (N, 2H, 2W, C) afterwards is
# a free adjacent-dim merge.  Column duplication = lane-axis concat, row
# duplication = two plane stores (no broadcast/reshape relayout in VMEM).
# ----------------------------------------------------------------------------
def _upsample2x_kernel(x_ref, o_ref):
    # x_ref: (1, th, W, C)   o_ref: (1, th, 2, W, 2C)
    x = x_ref[0]                                   # (th, W, C)
    xw = jnp.concatenate([x, x], axis=-1)          # (th, W, 2C): out[..., 2j+b, c] = x[..., j, c]
    o_ref[0, :, 0, :, :] = xw                      # even output rows
    o_ref[0, :, 1, :, :] = xw                      # odd output rows


def nearest_upsample_2x(x_nhwc):
    N, H, W, C = x_nhwc.shape
    itemsize = jnp.dtype(x_nhwc.dtype).itemsize
    limit, budget = _vmem_limits()
    th = _row_tile_for_upsample(H, W, C, itemsize, budget, N)
    nb = H // th
    out5 = pl.pallas_call(
        _upsample2x_kernel,
        out_shape=jax.ShapeDtypeStruct((N, H, 2, W, 2 * C), x_nhwc.dtype),
        grid=(N, nb),
        in_specs=[pl.BlockSpec((1, th, W, C), lambda n, ti: (n, ti, 0, 0))],
        out_specs=pl.BlockSpec((1, th, 2, W, 2 * C),
                               lambda n, ti: (n, ti, 0, 0, 0)),
        compiler_params=pltpu.CompilerParams(
            dimension_semantics=("parallel", "parallel"),
            vmem_limit_bytes=limit),
    )(x_nhwc)
    return out5.reshape(N, 2 * H, 2 * W, C)


# ----------------------------------------------------------------------------
# Kernel 2: fused nearest-2x upsample + 3x3 stride-1 'same' conv.
#
#   Y[2i+a, 2j+b] = bias + sum_{dr,dc in {0,1}} Xp[i+a+dr, j+b+dc] . Weff[a,b,dr,dc]
#
# Xp is the original input with a 1-px zero border (built in VMEM from the
# unpadded row tile + two 1-row halo blocks).  The 4 taps of each phase are
# concatenated along K, so each phase is ONE matmul (th*W, 4*Cin) x (4*Cin, Co).
# Output layout (N, H, 2, W, 2Co): column phase = lane concat, row phase =
# plane store, final reshape to (N, 2H, 2W, Co) is free.
# ----------------------------------------------------------------------------
def _make_fused_kernel(th, w, cin, cout):
    def kernel(x_ref, top_ref, bot_ref, w_ref, b_ref, o_ref):
        ti = pl.program_id(1)
        nb = pl.num_programs(1)
        dt = x_ref.dtype

        # Halo rows: zero them at the image top / bottom boundaries.
        top = top_ref[0] * (ti != 0).astype(dt)            # (1, W, Cin)
        bot = bot_ref[0] * (ti != nb - 1).astype(dt)        # (1, W, Cin)

        xr = jnp.concatenate([top, x_ref[0], bot], axis=0)  # (th+2, W, Cin)
        zc = jnp.zeros((th + 2, 1, cin), dt)
        xp = jnp.concatenate([zc, xr, zc], axis=1)          # (th+2, W+2, Cin)

        bias = b_ref[...].astype(jnp.float32)                # (1, Cout)

        for a in (0, 1):                                     # output row parity
            halves = []
            for b in (0, 1):                                 # output col parity
                p = 2 * a + b
                lhs = jnp.concatenate(
                    [xp[a:a + th,         b:b + w,         :],
                     xp[a:a + th,         b + 1:b + 1 + w, :],
                     xp[a + 1:a + 1 + th, b:b + w,         :],
                     xp[a + 1:a + 1 + th, b + 1:b + 1 + w, :]],
                    axis=-1).reshape(th * w, 4 * cin)        # (th*W, 4Cin) bf16
                acc = jnp.dot(lhs, w_ref[p],
                              preferred_element_type=jnp.float32)
                halves.append((acc + bias).astype(o_ref.dtype)
                              .reshape(th, w, cout))
            # lane-axis concat of the two column phases, then one plane store.
            o_ref[0, :, a, :, :] = jnp.concatenate(halves, axis=-1)
    return kernel


def fused_upsample2x_conv3x3(x_nhwc, w_eff, bias2, out_dtype):
    N, H, W, C = x_nhwc.shape
    Co = w_eff.shape[-1]
    in_isz = jnp.dtype(x_nhwc.dtype).itemsize
    out_isz = jnp.dtype(out_dtype).itemsize
    limit, budget = _vmem_limits()
    th = _row_tile_for_conv(H, W, C, Co, in_isz, out_isz, budget, N)
    nb = H // th

    kernel = _make_fused_kernel(th, W, C, Co)
    out5 = pl.pallas_call(
        kernel,
        out_shape=jax.ShapeDtypeStruct((N, H, 2, W, 2 * Co), out_dtype),
        grid=(N, nb),
        in_specs=[
            # main row tile
            pl.BlockSpec((1, th, W, C), lambda n, ti: (n, ti, 0, 0)),
            # top halo row (clamped; zeroed in-kernel at the image top)
            pl.BlockSpec((1, 1, W, C),
                         lambda n, ti: (n, jnp.maximum(ti * th - 1, 0), 0, 0)),
            # bottom halo row (clamped; zeroed in-kernel at the image bottom)
            pl.BlockSpec((1, 1, W, C),
                         lambda n, ti: (n, jnp.minimum((ti + 1) * th, H - 1), 0, 0)),
            # folded per-phase weights (4, 4*Cin, Cout) and bias
            pl.BlockSpec((4, 4 * C, Co), lambda n, ti: (0, 0, 0)),
            pl.BlockSpec((1, Co), lambda n, ti: (0, 0)),
        ],
        out_specs=pl.BlockSpec((1, th, 2, W, 2 * Co),
                               lambda n, ti: (n, ti, 0, 0, 0)),
        compiler_params=pltpu.CompilerParams(
            dimension_semantics=("parallel", "parallel"),
            vmem_limit_bytes=limit),
    )(x_nhwc, x_nhwc, x_nhwc, w_eff, bias2)
    return out5.reshape(N, 2 * H, 2 * W, Co)


# ----------------------------------------------------------------------------
# Module wrapper (mirrors models/unet.py::Upsample)
# ----------------------------------------------------------------------------
class Upsample:
    def __init__(self, in_channels, with_conv, key=None, compute_dtype=jnp.bfloat16):
        self.with_conv = with_conv
        self.compute_dtype = compute_dtype
        if self.with_conv:
            if key is None:
                key = jax.random.PRNGKey(0)
            kw, kb = jax.random.split(key)
            fan_in = in_channels * 3 * 3
            bound = 1.0 / (fan_in ** 0.5)          # PyTorch Conv2d default init bound
            # PyTorch weight layout: (out, in, kh, kw)
            self.w_oihw = jax.random.uniform(
                kw, (in_channels, in_channels, 3, 3), jnp.float32,
                minval=-bound, maxval=bound)
            self.b = jax.random.uniform(
                kb, (in_channels,), jnp.float32, minval=-bound, maxval=bound)

            # Fold the 3x3 weights into per-phase 2x2 taps, then regroup the
            # 4 taps of each phase along K -> (phase=4, 4*Cin, Cout).
            # A[a, dr, kh] selects which original kh contribute to tap dr of
            # output row-parity a (nearest-2x structure); same matrix for cols.
            w_hwio = jnp.transpose(self.w_oihw, (2, 3, 1, 0))            # (3,3,Cin,Cout)
            A = jnp.array([[[1., 0., 0.], [0., 1., 1.]],
                           [[1., 1., 0.], [0., 0., 1.]]], jnp.float32)
            w_eff = jnp.einsum('adh,bew,hwio->abdeio', A, A, w_hwio)     # (2,2,2,2,Ci,Co)
            self.w_eff = w_eff.reshape(4, 4 * in_channels,
                                       in_channels).astype(compute_dtype)
            self.b2 = self.b.reshape(1, in_channels).astype(jnp.float32)

    def __call__(self, x_nchw):
        # TODO(synk): NCHW<->NHWC transposes kept as XLA glue (interface is NCHW).
        x = jnp.transpose(x_nchw, (0, 2, 3, 1))                 # NCHW -> NHWC
        if self.with_conv:
            # bf16 cast fuses with the transpose copy (halves kernel input DMA).
            y = fused_upsample2x_conv3x3(x.astype(self.compute_dtype),
                                         self.w_eff, self.b2,
                                         out_dtype=x_nchw.dtype)
        else:
            y = nearest_upsample_2x(x)
        return jnp.transpose(y, (0, 3, 1, 2))                   # NHWC -> NCHW


# ----------------------------------------------------------------------------
# Pure-JAX reference for verification (no torch)
# ----------------------------------------------------------------------------
def _reference(x_nchw, module: Upsample):
    up = jnp.repeat(jnp.repeat(x_nchw, 2, axis=2), 2, axis=3)
    if not module.with_conv:
        return up
    out = jax.lax.conv_general_dilated(
        up, module.w_oihw, window_strides=(1, 1),
        padding=((1, 1), (1, 1)),
        dimension_numbers=("NCHW", "OIHW", "NCHW"))
    return out + module.b.reshape(1, -1, 1, 1)


if __name__ == "__main__":
    key = jax.random.PRNGKey(0)
    kx, kp = jax.random.split(key)

    N, C, H, W = 2, 4, 16, 16
    x = jax.random.normal(kx, (N, C, H, W), jnp.float32)

    # with_conv = True path (fused upsample + conv, bf16 MXU / f32 accumulate)
    up_conv = Upsample(C, with_conv=True, key=kp)
    y = jax.block_until_ready(up_conv(x))
    assert y.shape == (N, C, 2 * H, 2 * W), y.shape
    y_ref = _reference(x, up_conv)
    assert jnp.allclose(y, y_ref, rtol=1e-2, atol=1e-2), (
        float(jnp.max(jnp.abs(y - y_ref))))

    # with_conv = False path (pure nearest upsample)
    up_plain = Upsample(C, with_conv=False)
    z = jax.block_until_ready(up_plain(x))
    assert z.shape == (N, C, 2 * H, 2 * W), z.shape
    z_ref = _reference(x, up_plain)
    assert jnp.allclose(z, z_ref), float(jnp.max(jnp.abs(z - z_ref)))

    print("KERNEL_OK")
</pallas_src>

<mosaic_0001>
module attributes {stable_mosaic.version = 11 : i64} {
  func.func @kernel(%arg0: i32, %arg1: i32, %arg2: memref<1x16x16x4xbf16, #tpu.memory_space<vmem>>, %arg3: memref<1x1x16x4xbf16, #tpu.memory_space<vmem>>, %arg4: memref<1x1x16x4xbf16, #tpu.memory_space<vmem>>, %arg5: memref<4x16x4xbf16, #tpu.memory_space<vmem>>, %arg6: memref<1x4xf32, #tpu.memory_space<vmem>>, %arg7: memref<1x16x2x16x8xf32, #tpu.memory_space<vmem>>) attributes {dimension_semantics = [#tpu.dimension_semantics<parallel>, #tpu.dimension_semantics<parallel>], iteration_bounds = array<i64: 2, 1>, scalar_prefetch = 0 : i64, scratch_operands = 0 : i64, tpu.core_type = #tpu.core_type<tc>, window_params = [{transform_indices = @transform_0, window_bounds = array<i64: 1, 16, 16, 4>}, {transform_indices = @transform_1, window_bounds = array<i64: 1, 1, 16, 4>}, {transform_indices = @transform_2, window_bounds = array<i64: 1, 1, 16, 4>}, {pipeline_mode = #tpu.pipeline_mode<synchronous>, transform_indices = @transform_3, window_bounds = array<i64: 4, 16, 4>}, {pipeline_mode = #tpu.pipeline_mode<synchronous>, transform_indices = @transform_4, window_bounds = array<i64: 1, 4>}, {transform_indices = @transform_5, window_bounds = array<i64: 1, 16, 2, 16, 8>}]} {
    %c0 = arith.constant 0 : index
    %c0_0 = arith.constant 0 : index
    %c0_1 = arith.constant 0 : index
    %c0_2 = arith.constant 0 : index
    %0 = vector.load %arg3[%c0, %c0_0, %c0_1, %c0_2] : memref<1x1x16x4xbf16, #tpu.memory_space<vmem>>, vector<1x1x16x4xbf16>
    %1 = vector.shape_cast %0 : vector<1x1x16x4xbf16> to vector<1x16x4xbf16>
    %c0_i32 = arith.constant 0 : i32
    %2 = arith.cmpi ne, %arg1, %c0_i32 : i32
    %3 = arith.extui %2 : i1 to i32
    %4 = arith.sitofp %3 : i32 to f32
    %5 = arith.truncf %4 : f32 to bf16
    %6 = vector.broadcast %5 : bf16 to vector<1x16x4xbf16>
    %7 = arith.mulf %1, %6 : vector<1x16x4xbf16>
    %c0_3 = arith.constant 0 : index
    %c0_4 = arith.constant 0 : index
    %c0_5 = arith.constant 0 : index
    %c0_6 = arith.constant 0 : index
    %8 = vector.load %arg4[%c0_3, %c0_4, %c0_5, %c0_6] : memref<1x1x16x4xbf16, #tpu.memory_space<vmem>>, vector<1x1x16x4xbf16>
    %9 = vector.shape_cast %8 : vector<1x1x16x4xbf16> to vector<1x16x4xbf16>
    %c0_i32_7 = arith.constant 0 : i32
    %10 = arith.cmpi ne, %arg1, %c0_i32_7 : i32
    %11 = arith.extui %10 : i1 to i32
    %12 = arith.sitofp %11 : i32 to f32
    %13 = arith.truncf %12 : f32 to bf16
    %14 = vector.broadcast %13 : bf16 to vector<1x16x4xbf16>
    %15 = arith.mulf %9, %14 : vector<1x16x4xbf16>
    %c0_8 = arith.constant 0 : index
    %c0_9 = arith.constant 0 : index
    %c0_10 = arith.constant 0 : index
    %c0_11 = arith.constant 0 : index
    %16 = vector.load %arg2[%c0_8, %c0_9, %c0_10, %c0_11] : memref<1x16x16x4xbf16, #tpu.memory_space<vmem>>, vector<1x16x16x4xbf16>
    %17 = vector.shape_cast %16 : vector<1x16x16x4xbf16> to vector<16x16x4xbf16>
    %18 = tpu.concatenate %7, %17, %15 in 0 : vector<1x16x4xbf16>, vector<16x16x4xbf16>, vector<1x16x4xbf16> -> vector<18x16x4xbf16>
    %cst = arith.constant 0.000000e+00 : bf16
    %19 = vector.broadcast %cst : bf16 to vector<18x1x4xbf16>
    %20 = tpu.concatenate %19, %18, %19 in 1 : vector<18x1x4xbf16>, vector<18x16x4xbf16>, vector<18x1x4xbf16> -> vector<18x18x4xbf16>
    %c0_12 = arith.constant 0 : index
    %c0_13 = arith.constant 0 : index
    %21 = vector.load %arg6[%c0_12, %c0_13] : memref<1x4xf32, #tpu.memory_space<vmem>>, vector<1x4xf32>
    %22 = vector.extract_strided_slice %20 {offsets = [0, 0, 0], sizes = [16, 16, 4], strides = [1, 1, 1]} : vector<18x18x4xbf16> to vector<16x16x4xbf16>
    %23 = vector.extract_strided_slice %20 {offsets = [0, 1, 0], sizes = [16, 16, 4], strides = [1, 1, 1]} : vector<18x18x4xbf16> to vector<16x16x4xbf16>
    %24 = vector.extract_strided_slice %20 {offsets = [1, 0, 0], sizes = [16, 16, 4], strides = [1, 1, 1]} : vector<18x18x4xbf16> to vector<16x16x4xbf16>
    %25 = vector.extract_strided_slice %20 {offsets = [1, 1, 0], sizes = [16, 16, 4], strides = [1, 1, 1]} : vector<18x18x4xbf16> to vector<16x16x4xbf16>
    %26 = tpu.concatenate %22, %23, %24, %25 in 2 : vector<16x16x4xbf16>, vector<16x16x4xbf16>, vector<16x16x4xbf16>, vector<16x16x4xbf16> -> vector<16x16x16xbf16>
    %27 = vector.shape_cast %26 : vector<16x16x16xbf16> to vector<256x16xbf16>
    %c0_14 = arith.constant 0 : index
    %c0_15 = arith.constant 0 : index
    %c0_16 = arith.constant 0 : index
    %28 = vector.load %arg5[%c0_14, %c0_15, %c0_16] : memref<4x16x4xbf16, #tpu.memory_space<vmem>>, vector<1x16x4xbf16>
    %29 = vector.shape_cast %28 : vector<1x16x4xbf16> to vector<16x4xbf16>
    %cst_17 = arith.constant dense<0.000000e+00> : vector<256x4xf32>
    %30 = tpu.matmul %27, %29, %cst_17 {dimension_numbers = #tpu.dot_dimension_numbers<[1], [0], [0], [1], [0, 0, 1, 1], [], []>} : vector<256x16xbf16>, vector<16x4xbf16>, vector<256x4xf32> -> vector<256x4xf32>
    %31 = vector.broadcast %21 : vector<1x4xf32> to vector<256x4xf32>
    %32 = arith.addf %30, %31 : vector<256x4xf32>
    %33 = vector.shape_cast %32 : vector<256x4xf32> to vector<16x16x4xf32>
    %34 = vector.extract_strided_slice %20 {offsets = [0, 1, 0], sizes = [16, 16, 4], strides = [1, 1, 1]} : vector<18x18x4xbf16> to vector<16x16x4xbf16>
    %35 = vector.extract_strided_slice %20 {offsets = [0, 2, 0], sizes = [16, 16, 4], strides = [1, 1, 1]} : vector<18x18x4xbf16> to vector<16x16x4xbf16>
    %36 = vector.extract_strided_slice %20 {offsets = [1, 1, 0], sizes = [16, 16, 4], strides = [1, 1, 1]} : vector<18x18x4xbf16> to vector<16x16x4xbf16>
    %37 = vector.extract_strided_slice %20 {offsets = [1, 2, 0], sizes = [16, 16, 4], strides = [1, 1, 1]} : vector<18x18x4xbf16> to vector<16x16x4xbf16>
    %38 = tpu.concatenate %34, %35, %36, %37 in 2 : vector<16x16x4xbf16>, vector<16x16x4xbf16>, vector<16x16x4xbf16>, vector<16x16x4xbf16> -> vector<16x16x16xbf16>
    %39 = vector.shape_cast %38 : vector<16x16x16xbf16> to vector<256x16xbf16>
    %c1 = arith.constant 1 : index
    %c0_18 = arith.constant 0 : index
    %c0_19 = arith.constant 0 : index
    %40 = vector.load %arg5[%c1, %c0_18, %c0_19] : memref<4x16x4xbf16, #tpu.memory_space<vmem>>, vector<1x16x4xbf16>
    %41 = vector.shape_cast %40 : vector<1x16x4xbf16> to vector<16x4xbf16>
    %cst_20 = arith.constant dense<0.000000e+00> : vector<256x4xf32>
    %42 = tpu.matmul %39, %41, %cst_20 {dimension_numbers = #tpu.dot_dimension_numbers<[1], [0], [0], [1], [0, 0, 1, 1], [], []>} : vector<256x16xbf16>, vector<16x4xbf16>, vector<256x4xf32> -> vector<256x4xf32>
    %43 = vector.broadcast %21 : vector<1x4xf32> to vector<256x4xf32>
    %44 = arith.addf %42, %43 : vector<256x4xf32>
    %45 = vector.shape_cast %44 : vector<256x4xf32> to vector<16x16x4xf32>
    %46 = tpu.concatenate %33, %45 in 2 : vector<16x16x4xf32>, vector<16x16x4xf32> -> vector<16x16x8xf32>
    %c0_21 = arith.constant 0 : index
    %c0_22 = arith.constant 0 : index
    %c0_23 = arith.constant 0 : index
    %c0_24 = arith.constant 0 : index
    %c0_25 = arith.constant 0 : index
    %47 = vector.load %arg7[%c0_21, %c0_22, %c0_23, %c0_24, %c0_25] : memref<1x16x2x16x8xf32, #tpu.memory_space<vmem>>, vector<1x16x1x16x8xf32>
    %48 = vector.shape_cast %47 : vector<1x16x1x16x8xf32> to vector<16x16x8xf32>
    %49 = vector.shape_cast %46 : vector<16x16x8xf32> to vector<1x16x1x16x8xf32>
    tpu.vector_store %arg7[%c0_21, %c0_22, %c0_23, %c0_24, %c0_25], %49 {strides = array<i32>} : memref<1x16x2x16x8xf32, #tpu.memory_space<vmem>>, vector<1x16x1x16x8xf32>,
    %50 = vector.extract_strided_slice %20 {offsets = [1, 0, 0], sizes = [16, 16, 4], strides = [1, 1, 1]} : vector<18x18x4xbf16> to vector<16x16x4xbf16>
    %51 = vector.extract_strided_slice %20 {offsets = [1, 1, 0], sizes = [16, 16, 4], strides = [1, 1, 1]} : vector<18x18x4xbf16> to vector<16x16x4xbf16>
    %52 = vector.extract_strided_slice %20 {offsets = [2, 0, 0], sizes = [16, 16, 4], strides = [1, 1, 1]} : vector<18x18x4xbf16> to vector<16x16x4xbf16>
    %53 = vector.extract_strided_slice %20 {offsets = [2, 1, 0], sizes = [16, 16, 4], strides = [1, 1, 1]} : vector<18x18x4xbf16> to vector<16x16x4xbf16>
    %54 = tpu.concatenate %50, %51, %52, %53 in 2 : vector<16x16x4xbf16>, vector<16x16x4xbf16>, vector<16x16x4xbf16>, vector<16x16x4xbf16> -> vector<16x16x16xbf16>
    %55 = vector.shape_cast %54 : vector<16x16x16xbf16> to vector<256x16xbf16>
    %c2 = arith.constant 2 : index
    %c0_26 = arith.constant 0 : index
    %c0_27 = arith.constant 0 : index
    %56 = vector.load %arg5[%c2, %c0_26, %c0_27] : memref<4x16x4xbf16, #tpu.memory_space<vmem>>, vector<1x16x4xbf16>
    %57 = vector.shape_cast %56 : vector<1x16x4xbf16> to vector<16x4xbf16>
    %cst_28 = arith.constant dense<0.000000e+00> : vector<256x4xf32>
    %58 = tpu.matmul %55, %57, %cst_28 {dimension_numbers = #tpu.dot_dimension_numbers<[1], [0], [0], [1], [0, 0, 1, 1], [], []>} : vector<256x16xbf16>, vector<16x4xbf16>, vector<256x4xf32> -> vector<256x4xf32>
    %59 = vector.broadcast %21 : vector<1x4xf32> to vector<256x4xf32>
    %60 = arith.addf %58, %59 : vector<256x4xf32>
    %61 = vector.shape_cast %60 : vector<256x4xf32> to vector<16x16x4xf32>
    %62 = vector.extract_strided_slice %20 {offsets = [1, 1, 0], sizes = [16, 16, 4], strides = [1, 1, 1]} : vector<18x18x4xbf16> to vector<16x16x4xbf16>
    %63 = vector.extract_strided_slice %20 {offsets = [1, 2, 0], sizes = [16, 16, 4], strides = [1, 1, 1]} : vector<18x18x4xbf16> to vector<16x16x4xbf16>
    %64 = vector.extract_strided_slice %20 {offsets = [2, 1, 0], sizes = [16, 16, 4], strides = [1, 1, 1]} : vector<18x18x4xbf16> to vector<16x16x4xbf16>
    %65 = vector.extract_strided_slice %20 {offsets = [2, 2, 0], sizes = [16, 16, 4], strides = [1, 1, 1]} : vector<18x18x4xbf16> to vector<16x16x4xbf16>
    %66 = tpu.concatenate %62, %63, %64, %65 in 2 : vector<16x16x4xbf16>, vector<16x16x4xbf16>, vector<16x16x4xbf16>, vector<16x16x4xbf16> -> vector<16x16x16xbf16>
    %67 = vector.shape_cast %66 : vector<16x16x16xbf16> to vector<256x16xbf16>
    %c3 = arith.constant 3 : index
    %c0_29 = arith.constant 0 : index
    %c0_30 = arith.constant 0 : index
    %68 = vector.load %arg5[%c3, %c0_29, %c0_30] : memref<4x16x4xbf16, #tpu.memory_space<vmem>>, vector<1x16x4xbf16>
    %69 = vector.shape_cast %68 : vector<1x16x4xbf16> to vector<16x4xbf16>
    %cst_31 = arith.constant dense<0.000000e+00> : vector<256x4xf32>
    %70 = tpu.matmul %67, %69, %cst_31 {dimension_numbers = #tpu.dot_dimension_numbers<[1], [0], [0], [1], [0, 0, 1, 1], [], []>} : vector<256x16xbf16>, vector<16x4xbf16>, vector<256x4xf32> -> vector<256x4xf32>
    %71 = vector.broadcast %21 : vector<1x4xf32> to vector<256x4xf32>
    %72 = arith.addf %70, %71 : vector<256x4xf32>
    %73 = vector.shape_cast %72 : vector<256x4xf32> to vector<16x16x4xf32>
    %74 = tpu.concatenate %61, %73 in 2 : vector<16x16x4xf32>, vector<16x16x4xf32> -> vector<16x16x8xf32>
    %c0_32 = arith.constant 0 : index
    %c0_33 = arith.constant 0 : index
    %c1_34 = arith.constant 1 : index
    %c0_35 = arith.constant 0 : index
    %c0_36 = arith.constant 0 : index
    %75 = vector.load %arg7[%c0_32, %c0_33, %c1_34, %c0_35, %c0_36] : memref<1x16x2x16x8xf32, #tpu.memory_space<vmem>>, vector<1x16x1x16x8xf32>
    %76 = vector.shape_cast %75 : vector<1x16x1x16x8xf32> to vector<16x16x8xf32>
    %77 = vector.shape_cast %74 : vector<16x16x8xf32> to vector<1x16x1x16x8xf32>
    tpu.vector_store %arg7[%c0_32, %c0_33, %c1_34, %c0_35, %c0_36], %77 {strides = array<i32>} : memref<1x16x2x16x8xf32, #tpu.memory_space<vmem>>, vector<1x16x1x16x8xf32>,
    return
  }
  func.func @transform_0(%arg0: i32, %arg1: i32) -> (i32, i32, i32, i32) {
    %c0_i32 = arith.constant 0 : i32
    %c0_i32_0 = arith.constant 0 : i32
    %c0_i32_1 = arith.constant 0 : i32
    return %arg0, %arg1, %c0_i32, %c0_i32_0 : i32, i32, i32, i32
  }
  func.func @transform_1(%arg0: i32, %arg1: i32) -> (i32, i32, i32, i32) {
    %c16_i32 = arith.constant 16 : i32
    %0 = arith.muli %arg1, %c16_i32 : i32
    %c1_i32 = arith.constant 1 : i32
    %1 = arith.subi %0, %c1_i32 : i32
    %c0_i32 = arith.constant 0 : i32
    %2 = arith.maxsi %1, %c0_i32 : i32
    %c0_i32_0 = arith.constant 0 : i32
    %c0_i32_1 = arith.constant 0 : i32
    %c0_i32_2 = arith.constant 0 : i32
    return %arg0, %2, %c0_i32_0, %c0_i32_1 : i32, i32, i32, i32
  }
  func.func @transform_2(%arg0: i32, %arg1: i32) -> (i32, i32, i32, i32) {
    %c1_i32 = arith.constant 1 : i32
    %0 = arith.addi %arg1, %c1_i32 : i32
    %c16_i32 = arith.constant 16 : i32
    %1 = arith.muli %0, %c16_i32 : i32
    %c15_i32 = arith.constant 15 : i32
    %2 = arith.minsi %1, %c15_i32 : i32
    %c0_i32 = arith.constant 0 : i32
    %c0_i32_0 = arith.constant 0 : i32
    %c0_i32_1 = arith.constant 0 : i32
    return %arg0, %2, %c0_i32, %c0_i32_0 : i32, i32, i32, i32
  }
  func.func @transform_3(%arg0: i32, %arg1: i32) -> (i32, i32, i32) {
    %c0_i32 = arith.constant 0 : i32
    %c0_i32_0 = arith.constant 0 : i32
    %c0_i32_1 = arith.constant 0 : i32
    %c0_i32_2 = arith.constant 0 : i32
    return %c0_i32, %c0_i32_0, %c0_i32_1 : i32, i32, i32
  }
  func.func @transform_4(%arg0: i32, %arg1: i32) -> (i32, i32) {
    %c0_i32 = arith.constant 0 : i32
    %c0_i32_0 = arith.constant 0 : i32
    %c0_i32_1 = arith.constant 0 : i32
    return %c0_i32, %c0_i32_0 : i32, i32
  }
  func.func @transform_5(%arg0: i32, %arg1: i32) -> (i32, i32, i32, i32, i32) {
    %c0_i32 = arith.constant 0 : i32
    %c0_i32_0 = arith.constant 0 : i32
    %c0_i32_1 = arith.constant 0 : i32
    %c0_i32_2 = arith.constant 0 : i32
    return %arg0, %arg1, %c0_i32, %c0_i32_0, %c0_i32_1 : i32, i32, i32, i32, i32
  }
}

</mosaic_0001>

<bundles_post_ra>
// kernel: tpu_custom_call.1
= control target key start
LH: loop header
LB: loop body
LE: loop exit
PB: predicated region body
PF: predicated region fallthrough
CT: control target
= control target key end

     0   :  { %s3360_s18 = smov 0   ;;  %s3362_s19 = smov 0   ;;  %s4758_s0 = inlined_call_operand.vmem [shape: bf16[2,16,16,4], index: 0, kind: input, shape index: {}]   ;;  %s4759_s1 = inlined_call_operand.vmem [shape: bf16[2,16,16,4], index: 1, kind: input, shape index: {}]   ;;  %s4760_s2 = inlined_call_operand.vmem [shape: bf16[2,16,16,4], index: 2, kind: input, shape index: {}]   ;;  %s4761_s3 = inlined_call_operand.vmem [shape: bf16[4,16,4], index: 3, kind: input, shape index: {}]   ;;  %s4762_s4 = inlined_call_operand.vmem [shape: f32[1,4], index: 4, kind: input, shape index: {}]   ;;  %s4763_s5 = inlined_call_operand.vmem [shape: f32[2,16,2,16,8], index: 5, kind: output, shape index: {}]  }
   0x1   :  { %s3364_s20 = smov 0  }
   0x2 LB: > { %s27_s21 = sadd.s32 1, %s3321_s19  ;;  %p2909_p0 = scmp.ge.s32.totalorder %s3325_s20, 1  ;;  %s3325_s20 = sphi %s3364_s20, %s15_s20   ;;  %s3321_s19 = sphi %s3362_s19, %s4767_s19   ;;  %s3317_s18 = sphi %s3360_s18, %s4766_s18  }
   0x3   : > { %p29_p1 = scmp.ge.s32.totalorder %s27_s21, 2  ;;  %p273_p2 = scmp.lt.s32.totalorder %s3325_s20, 3 }
   0x5   : > { %s4769_s21 = smov (%p29_p1, %s27_s21), 0  ;;  %p274_p3 = pnand %p2909_p0, %p273_p2 }
   0x6   : > { %p338_p4 = scmp.lt.s32.totalorder (!%p274_p3), %s3317_s18, 1  ;;  %vm704_vm0 = vsmask.f32 (!%p274_p3), 256  ;;  %vm703_vm1 = vcmask (!%p274_p3), 1040384   ;;  %s3327_s29 = smov (!%p274_p3), 8   ;;  %v3294_v51 = vld [vmem:[%s4761_s3] sm:$0xff] (!%p274_p3)  }
   0x7   : > { %277 = sbr.rel (%p274_p3) target bundleno = 737 (0x2e1), region = 40  ;;  %vm3395_vm2 = vmand (!%p274_p3), %vm703_vm1, %vm704_vm0  ;;  %s3328_s30 = smov (!%p274_p3), 12   ;;  %vm743_vm3 = vsmask.f32 (!%p274_p3), 7424  ;;  %3119 = vmatprep.subr.bf16.mxu0 (!%p274_p3), %v3294_v51  ;;  %vm1060_vm4 = vcmask (!%p274_p3), 31744   ;;  %vm1093_vm5 = vcmask (!%p274_p3), 64512  }
   0x8   : > { %s3329_s6 = smov (!%p274_p3), 4   ;;  %3120 = vmatpush3.bf16.msra.mxu0 (!%p274_p3), %v3294_v51  ;;  %vm1126_vm6 = vcmask (!%p274_p3), 97280   ;;  %vm1173_vm7 = vcmask (!%p274_p3), 130048  }
   0xe   : > { %s4771_s18 = smov (!%p338_p4, %s3317_s18), 1 }
   0xf   : > { %s3381_s22 = sshll.u32 %s4771_s18, 7 }
  0x10   : > { %s3387_s25 = scalar_lea.vmem %s4758_s0, %s3381_s22  ;;  %s360_s28 = scalar_lea.vmem %s4759_s1, %s3381_s22 }
  0x11   : > { %v3282_v0 = vld [vmem:[%s3387_s25 + $0x8] sm:$0xff]   ;;  %v3283_v1 = vld [vmem:[%s3387_s25] sm:$0xff]   ;;  %v3284_v12 = vld [vmem:[%s3387_s25 + $0x10] sm:$0xff]   ;;  %s3048_s13 = sadd.s32 120, %s3381_s22 }
  0x12   : > { %v556_v2 = vshrl.u32 %v3282_v0, 16  ;;  %v559_v3 = vshll.u32 %v3282_v0, 16  ;;  %v394_v4 = vld [vmem:[%s360_s28] sm:$0xf]  ;;  %v395_v5 = vld [vmem:[%s360_s28 + $0x4] sm:$0xf]  ;;  %s377_s16 = scalar_lea.vmem %s4760_s2, %s3048_s13 }
  0x13   : > { %v549_v7 = vshrl.u32 %v3283_v1, 16  ;;  %v552_v8 = vshll.u32 %v3283_v1, 16  ;;  %v413_v9 = vmul.bf16 0.0, %v394_v4  ;;  %v414_v10 = vmul.bf16 0.0, %v395_v5  ;;  %v3285_v36 = vld [vmem:[%s3387_s25 + $0x18] sm:$0xff]   ;;  %v3286_v56 = vld [vmem:[%s3387_s25 + $0x20] sm:$0xff]  }
  0x14   : > { %v558_v11 = vrot.slane %v556_v2, 7  ;;  %v563_v23 = vshrl.u32 %v3284_v12, 16  ;;  %v566_v30 = vshll.u32 %v3284_v12, 16  ;;  %v570_v47 = vshrl.u32 %v3285_v36, 16  ;;  %v3296_v4 = vld [vmem:[%s4761_s3 + $0x8] sm:$0xff]  }
  0x15   : > { %v551_v13 = vrot.slane %v549_v7, 7  ;;  %v2918_v14 = vcombine.low %v413_v9, %v414_v10  ;;  %v573_v58 = vshll.u32 %v3285_v36, 16  ;;  %3153 = vmatprep.subr.bf16.mxu1 %v3296_v4 }
  0x16   : > { %v3402_v15 = vsel %vm3395_vm2, %v558_v11, 0  ;;  %v561_v16 = vor.u32 %v559_v3, %v558_v11  ;;  %v565_v34 = vrot.slane %v563_v23, 7  ;;  %v572_v57 = vrot.slane %v570_v47, 7  ;;  %3154 = vmatpush3.bf16.msra.mxu1 %v3296_v4 }
  0x17   : > { %1449 = vrot.lane.b32.xlu1 %v3402_v15, %s3327_s29  ;;  %v3408_v17 = vsel %vm3395_vm2, %v551_v13, 0  ;;  %v554_v18 = vor.u32 %v552_v8, %v551_v13  ;;  %v542_v19 = vshrl.u32 %v2918_v14, 16  ;;  %v545_v20 = vshll.u32 %v2918_v14, 16 }
  0x18   : > { %1447 = vrot.lane.b32.xlu0 %v3408_v17, %s3327_s29  ;;  %v1369_v21 = vshrl.u32 %v3408_v17, 16  ;;  %v764_v22 = vshll.u32 %v3408_v17, 16  ;;  %v3420_v25 = vsel %vm3395_vm2, 0, %v561_v16  ;;  %v776_v35 = vshll.u32 %v3402_v15, 16 }
  0x19   : > { %v3416_v24 = vsel %vm3395_vm2, 0, %v554_v18  ;;  %v544_v26 = vrot.slane %v542_v19, 7  ;;  %v771_v29 = vshll.u32 %v3420_v25, 16  ;;  %v769_v37 = vshrl.u32 %v3420_v25, 16 }
  0x1a   : > { %v757_v27 = vshrl.u32 %v3416_v24, 16  ;;  %v759_v28 = vshll.u32 %v3416_v24, 16  ;;  %v766_v33 = vrot.slane %v764_v22, 1  ;;  %v568_v40 = vor.u32 %v566_v30, %v565_v34  ;;  %v3287_v22 = vld [vmem:[%s3387_s25 + $0x28] sm:$0xff]  }
  0x1b   : > { %984 = vrot.lane.b32.xlu1 %v3416_v24, %s3327_s29  ;;  %v547_v31 = vor.u32 %v545_v20, %v544_v26  ;;  %v773_v38 = vrot.slane %v771_v29, 1  ;;  %v3440_v43 = vsel %vm3395_vm2, %v544_v26, 0  ;;  %v3449_v45 = vsel %vm3395_vm2, %v565_v34, 0 }
  0x1c   : > { %v761_v32 = vrot.slane %v759_v28, 1  ;;  %1481 = vrot.lane.b32.xlu0 %v1369_v21, %s3328_s30  ;;  %v3444_v44 = vsel %vm3395_vm2, 0, %v568_v40  ;;  %v778_v49 = vrot.slane %v776_v35, 1  ;;  %v1367_v52 = vshrl.u32 %v3440_v43, 16 }
  0x1d   : > { %v3435_v41 = vsel %vm3395_vm2, 0, %v547_v31  ;;  %v783_v46 = vshll.u32 %v3444_v44, 16  ;;  %v774_v48 = vor.u32 %v773_v38, %v769_v37  ;;  %v781_v53 = vshrl.u32 %v3444_v44, 16  ;;  %v3288_v37 = vld [vmem:[%s3387_s25 + $0x30] sm:$0xff]  }
  0x1e   : > { %v762_v39 = vor.u32 %v761_v32, %v757_v27  ;;  %v747_v50 = vshll.u32 %v3435_v41, 16  ;;  %v788_v55 = vshll.u32 %v3449_v45, 16  ;;  %v745_v60 = vshrl.u32 %v3435_v41, 16 }
  0x1f   : > { %986 = vrot.lane.b32.xlu1 %v3420_v25, %s3327_s29  ;;  %v785_v54 = vrot.slane %v783_v46, 1  ;;  %v779_v59 = vsel %vm743_vm3, %v774_v48, %v778_v49  ;;  %v752_v62 = vshll.u32 %v3440_v43, 16  ;;  %v1371_v63 = vshrl.u32 %v3402_v15, 16 }
  0x20   : > { %v767_v42 = vsel %vm743_vm3, %v762_v39, %v766_v33  ;;  %v749_v61 = vrot.slane %v747_v50, 1  ;;  %v790_v1 = vrot.slane %v788_v55, 1  ;;  %v575_v2 = vor.u32 %v573_v58, %v572_v57  ;;  %v3289_v58 = vld [vmem:[%s3387_s25 + $0x38] sm:$0xff]  }
  0x21   : > { %938 = vrot.lane.b32.xlu0 %v767_v42, %s3329_s6  ;;  %v786_v0 = vor.u32 %v785_v54, %v781_v53  ;;  %v577_v3 = vshrl.u32 %v3286_v56, 16  ;;  %v754_v7 = vrot.slane %v752_v62, 1  ;;  %v580_v11 = vshll.u32 %v3286_v56, 16 }
  0x22   : > { %v750_v5 = vor.u32 %v749_v61, %v745_v60  ;;  %v3476_v9 = vsel %vm3395_vm2, 0, %v575_v2  ;;  %v3483_v14 = vsel %vm3395_vm2, %v572_v57, 0  ;;  %v1373_v27 = vshrl.u32 %v3449_v45, 16 }
  0x23   : > { %1401 = vrot.lane.b32.xlu1 %v1369_v21, %s3329_s6  ;;  %v791_v8 = vsel %vm743_vm3, %v786_v0, %v790_v1  ;;  %v579_v10 = vrot.slane %v577_v3, 7  ;;  %v795_v13 = vshll.u32 %v3476_v9, 16  ;;  %v793_v18 = vshrl.u32 %v3476_v9, 16 }
  0x24   : > { %v755_v12 = vsel %vm743_vm3, %v750_v5, %v754_v7  ;;  %v800_v20 = vshll.u32 %v3483_v14, 16  ;;  %v584_v30 = vshrl.u32 %v3287_v22, 16  ;;  %v587_v36 = vshll.u32 %v3287_v22, 16 }
  0x25   : > { %1028 = vrot.lane.b32.xlu0 %v767_v42, %s3328_s30  ;;  %v582_v16 = vor.u32 %v580_v11, %v579_v10  ;;  %v797_v19 = vrot.slane %v795_v13, 1  ;;  %v3503_v29 = vsel %vm3395_vm2, %v579_v10, 0  ;;  %v1375_v38 = vshrl.u32 %v3483_v14, 16 }
  0x26   : > { %v802_v26 = vrot.slane %v800_v20, 1  ;;  %v812_v34 = vshll.u32 %v3503_v29, 16  ;;  %v586_v35 = vrot.slane %v584_v30, 7  ;;  %v591_v46 = vshrl.u32 %v3288_v37, 16 }
  0x27   : > { %1399 = vrot.lane.b32.xlu1 %v1367_v52, %s3329_s6  ;;  %v3494_v21 = vsel %vm3395_vm2, 0, %v582_v16  ;;  %v798_v23 = vor.u32 %v797_v19, %v793_v18  ;;  %v594_v50 = vshll.u32 %v3288_v37, 16  ;;  %v1377_v61 = vshrl.u32 %v3503_v29, 16 }
  0x28   : > { %v807_v28 = vshll.u32 %v3494_v21, 16  ;;  %v805_v32 = vshrl.u32 %v3494_v21, 16  ;;  %v814_v40 = vrot.slane %v812_v34, 1  ;;  %v589_v42 = vor.u32 %v587_v36, %v586_v35 }
  0x29   : > { %1030 = vrot.lane.b32.xlu0 %v779_v59, %s3328_s30  ;;  %v803_v31 = vsel %vm743_vm3, %v798_v23, %v802_v26  ;;  %v593_v49 = vrot.slane %v591_v46, 7  ;;  %v3527_v52 = vsel %vm3395_vm2, %v586_v35, 0  ;;  %v598_v0 = vshrl.u32 %v3289_v58, 16 }
  0x2a   : > { %v809_v33 = vrot.slane %v807_v28, 1  ;;  %v3521_v48 = vsel %vm3395_vm2, 0, %v589_v42  ;;  %v824_v56 = vshll.u32 %v3527_v52, 16  ;;  %v601_v7 = vshll.u32 %v3289_v58, 16 }
  0x2b   : > { %1483 = vrot.lane.b32.xlu1 %v1371_v63, %s3328_s30  ;;  %v819_v51 = vshll.u32 %v3521_v48, 16  ;;  %v596_v53 = vor.u32 %v594_v50, %v593_v49  ;;  %v817_v54 = vshrl.u32 %v3521_v48, 16  ;;  %v600_v5 = vrot.slane %v598_v0, 7 }
  0x2c   : > { %v810_v39 = vor.u32 %v809_v33, %v805_v32  ;;  %v826_v60 = vrot.slane %v824_v56, 1  ;;  %v1379_v10 = vshrl.u32 %v3527_v52, 16  ;;  %v3291_v33 = vld [vmem:[%s3387_s25 + $0x48] sm:$0xff]  }
  0x2d   : > { %940 = vrot.lane.b32.xlu0 %v779_v59, %s3329_s6  ;;  %v821_v55 = vrot.slane %v819_v51, 1  ;;  %v3538_v57 = vsel %vm3395_vm2, 0, %v596_v53  ;;  %v603_v13 = vor.u32 %v601_v7, %v600_v5  ;;  %v3571_v26 = vsel %vm3395_vm2, %v600_v5, 0  ;;  %v3292_v51 = vld [vmem:[%s3387_s25 + $0x50] sm:$0xff]  }
  0x2e   : > { %v815_v47 = vsel %vm743_vm3, %v810_v39, %v814_v40  ;;  %v831_v62 = vshll.u32 %v3538_v57, 16  ;;  %v829_v2 = vshrl.u32 %v3538_v57, 16  ;;  %v612_v39 = vshrl.u32 %v3291_v33, 16 }
  0x2f   : > { %942 = vrot.lane.b32.xlu1 %v791_v8, %s3329_s6  ;;  %v822_v59 = vor.u32 %v821_v55, %v817_v54  ;;  %v3565_v19 = vsel %vm3395_vm2, 0, %v603_v13  ;;  %v615_v50 = vshll.u32 %v3291_v33, 16  ;;  %v1383_v53 = vshrl.u32 %v3571_v26, 16 }
  0x30   : > { %v833_v3 = vrot.slane %v831_v62, 1  ;;  %v843_v23 = vshll.u32 %v3565_v19, 16  ;;  %v841_v28 = vshrl.u32 %v3565_v19, 16  ;;  %v619_v58 = vshrl.u32 %v3292_v51, 16 }
  0x31   : > { %936 = vrot.lane.b32.xlu0 %v755_v12, %s3329_s6  ;;  %v827_v1 = vsel %vm743_vm3, %v822_v59, %v826_v60  ;;  %v622_v62 = vshll.u32 %v3292_v51, 16 }
  0x32   : > { %v834_v11 = vor.u32 %v833_v3, %v829_v2  ;;  %v845_v30 = vrot.slane %v843_v23, 1 }
  0x33   : > { %990 = vrot.lane.b32.xlu1 %v3476_v9, %s3327_s29 }
  0x34   : > { %v846_v34 = vor.u32 %v845_v30, %v841_v28 }
  0x35   : > { %988 = vrot.lane.b32.xlu0 %v3444_v44, %s3327_s29 }
  0x37   : > { %1403 = vrot.lane.b32.xlu1 %v1371_v63, %s3329_s6  ;;  %v3547_v63 = vsel %vm3395_vm2, %v593_v49, 0  ;;  %v614_v49 = vrot.slane %v612_v39, 7 }
  0x38   : > { %v836_v4 = vshll.u32 %v3547_v63, 16  ;;  %v1381_v36 = vshrl.u32 %v3547_v63, 16 }
  0x39   : > { %1032 = vrot.lane.b32.xlu0 %v791_v8, %s3328_s30  ;;  %v3290_v8 = vld [vmem:[%s3387_s25 + $0x40] sm:$0xff]   ;;  %v617_v56 = vor.u32 %v615_v50, %v614_v49 }
  0x3a   : > { %v838_v12 = vrot.slane %v836_v4, 1  ;;  %v605_v16 = vshrl.u32 %v3290_v8, 16  ;;  %v608_v22 = vshll.u32 %v3290_v8, 16  ;;  %v3293_v8 = vld [vmem:[%s3387_s25 + $0x58] sm:$0xff]  }
  0x3b   : > { %1405 = vrot.lane.b32.xlu1 %v1373_v27, %s3329_s6  ;;  %v3609_v60 = vsel %vm3395_vm2, 0, %v617_v56  ;;  %v629_v30 = vshll.u32 %v3293_v8, 16 }
  0x3c   : > { %v839_v18 = vsel %vm743_vm3, %v834_v11, %v838_v12  ;;  %v607_v20 = vrot.slane %v605_v16, 7  ;;  %v867_v0 = vshll.u32 %v3609_v60, 16  ;;  %v865_v3 = vshrl.u32 %v3609_v60, 16 }
  0x3d   : > { %1034 = vrot.lane.b32.xlu0 %v803_v31, %s3328_s30 }
  0x3e   : > { %v869_v4 = vrot.slane %v867_v0, 1 }
  0x3f   : > { %1453 = vrot.lane.b32.xlu1 %v3483_v14, %s3327_s29 }
  0x41   : > { %1451 = vrot.lane.b32.xlu0 %v3449_v45, %s3327_s29 }
  0x43   : > { %1487 = vrot.lane.b32.xlu1 %v1375_v38, %s3328_s30 }
  0x45   : > { %1485 = vrot.lane.b32.xlu0 %v1373_v27, %s3328_s30  ;;  %v610_v27 = vor.u32 %v608_v22, %v607_v20 }
  0x47   : > { %946 = vrot.lane.b32.xlu1 %v815_v47, %s3329_s6  ;;  %v3582_v32 = vsel %vm3395_vm2, 0, %v610_v27 }
  0x48   : > { %v855_v37 = vshll.u32 %v3582_v32, 16  ;;  %v853_v42 = vshrl.u32 %v3582_v32, 16 }
  0x49   : > { %944 = vrot.lane.b32.xlu0 %v803_v31, %s3329_s6  ;;  %v848_v31 = vshll.u32 %v3571_v26, 16 }
  0x4a   : > { %v857_v46 = vrot.slane %v855_v37, 1 }
  0x4b   : > { %994 = vrot.lane.b32.xlu1 %v3521_v48, %s3327_s29  ;;  %v850_v35 = vrot.slane %v848_v31, 1  ;;  %v3295_v31 = vld [vmem:[%s3387_s25 + $0x60] sm:$0xff]  }
  0x4c   : > { %v858_v54 = vor.u32 %v857_v46, %v853_v42  ;;  %v633_v39 = vshrl.u32 %v3295_v31, 16  ;;  %v636_v50 = vshll.u32 %v3295_v31, 16 }
  0x4d   : > { %992 = vrot.lane.b32.xlu0 %v3494_v21, %s3327_s29  ;;  %v851_v40 = vsel %vm743_vm3, %v846_v34, %v850_v35 }
  0x4f   : > { %1407 = vrot.lane.b32.xlu1 %v1375_v38, %s3329_s6  ;;  %v3591_v38 = vsel %vm3395_vm2, %v607_v20, 0 }
  0x50   : > { %v1385_v12 = vshrl.u32 %v3591_v38, 16 }
  0x51   : > { %1036 = vrot.lane.b32.xlu0 %v815_v47, %s3328_s30  ;;  %v860_v47 = vshll.u32 %v3591_v38, 16 }
  0x53   : > { %1409 = vrot.lane.b32.xlu1 %v1377_v61, %s3329_s6  ;;  %v862_v55 = vrot.slane %v860_v47, 1 }
  0x55   : > { %1038 = vrot.lane.b32.xlu0 %v827_v1, %s3328_s30  ;;  %v863_v59 = vsel %vm743_vm3, %v858_v54, %v862_v55 }
  0x57   : > { %1457 = vrot.lane.b32.xlu1 %v3527_v52, %s3327_s29 }
  0x59   : > { %1455 = vrot.lane.b32.xlu0 %v3503_v29, %s3327_s29 }
  0x5b   : > { %1491 = vrot.lane.b32.xlu1 %v1379_v10, %s3328_s30 }
  0x5d   : > { %1489 = vrot.lane.b32.xlu0 %v1377_v61, %s3328_s30  ;;  %v621_v61 = vrot.slane %v619_v58, 7 }
  0x5f   : > { %950 = vrot.lane.b32.xlu1 %v839_v18, %s3329_s6  ;;  %v624_v2 = vor.u32 %v622_v62, %v621_v61  ;;  %v3635_v16 = vsel %vm3395_vm2, %v621_v61, 0 }
  0x60   : > { %v884_v27 = vshll.u32 %v3635_v16, 16 }
  0x61   : > { %948 = vrot.lane.b32.xlu0 %v827_v1, %s3329_s6  ;;  %v3615_v1 = vsel %vm3395_vm2, %v614_v49, 0  ;;  %v3626_v7 = vsel %vm3395_vm2, 0, %v624_v2  ;;  %v635_v49 = vrot.slane %v633_v39, 7 }
  0x62   : > { %v872_v5 = vshll.u32 %v3615_v1, 16  ;;  %v879_v13 = vshll.u32 %v3626_v7, 16  ;;  %v877_v22 = vshrl.u32 %v3626_v7, 16  ;;  %v1387_v33 = vshrl.u32 %v3615_v1, 16 }
  0x63   : > { %998 = vrot.lane.b32.xlu1 %v3565_v19, %s3327_s29  ;;  %v886_v35 = vrot.slane %v884_v27, 1  ;;  %v638_v56 = vor.u32 %v636_v50, %v635_v49 }
  0x64   : > { %v874_v11 = vrot.slane %v872_v5, 1  ;;  %v881_v23 = vrot.slane %v879_v13, 1 }
  0x65   : > { %996 = vrot.lane.b32.xlu0 %v3538_v57, %s3327_s29  ;;  %v3676_v2 = vsel %vm3395_vm2, 0, %v638_v56 }
  0x66   : > { %v882_v34 = vor.u32 %v881_v23, %v877_v22 }
  0x67   : > { %1411 = vrot.lane.b32.xlu1 %v1379_v10, %s3329_s6  ;;  %v870_v10 = vor.u32 %v869_v4, %v865_v3  ;;  %v3297_v3 = vld [vmem:[%s3387_s25 + $0x68] sm:$0xff]   ;;  %v3682_v4 = vld [vmem:[%s4761_s3 + $0x18] sm:$0xff]  }
  0x68   : > { %v887_v42 = vsel %vm743_vm3, %v882_v34, %v886_v35  ;;  %3221 = vmatprep.subr.bf16.mxu1 %v3682_v4  ;;  %v643_v35 = vshll.u32 %v3297_v3, 16 }
  0x69   : > { %1040 = vrot.lane.b32.xlu0 %v839_v18, %s3328_s30  ;;  %v626_v18 = vshrl.u32 %v3293_v8, 16  ;;  %v875_v20 = vsel %vm743_vm3, %v870_v10, %v874_v11  ;;  %v1389_v11 = vshrl.u32 %v3635_v16, 16 }
  0x6b   : > { %1413 = vrot.lane.b32.xlu1 %v1381_v36, %s3329_s6  ;;  %v628_v28 = vrot.slane %v626_v18, 7  ;;  %v3691_v18 = vsel %vm3395_vm2, %v635_v49, 0 }
  0x6c   : > { %v908_v31 = vshll.u32 %v3691_v18, 16 }
  0x6d   : > { %1042 = vrot.lane.b32.xlu0 %v851_v40, %s3328_s30  ;;  %v631_v37 = vor.u32 %v629_v30, %v628_v28  ;;  %v3665_v54 = vsel %vm3395_vm2, %v628_v28, 0  ;;  %v901_v28 = vshrl.u32 %v3676_v2, 16 }
  0x6e   : > { %v896_v61 = vshll.u32 %v3665_v54, 16 }
  0x6f   : > { %1461 = vrot.lane.b32.xlu1 %v3571_v26, %s3327_s29  ;;  %v3657_v47 = vsel %vm3395_vm2, 0, %v631_v37  ;;  %v3298_v37 = vld [vmem:[%s3387_s25 + $0x70] sm:$0xff]  }
  0x70   : > { %v889_v58 = vshrl.u32 %v3657_v47, 16  ;;  %v898_v8 = vrot.slane %v896_v61, 1  ;;  %v647_v61 = vshrl.u32 %v3298_v37, 16 }
  0x71   : > { %1459 = vrot.lane.b32.xlu0 %v3547_v63, %s3327_s29 }
  0x73   : > { %1495 = vrot.lane.b32.xlu1 %v1383_v53, %s3328_s30 }
  0x75   : > { %1493 = vrot.lane.b32.xlu0 %v1381_v36, %s3328_s30 }
  0x77   : > { %954 = vrot.lane.b32.xlu1 %v863_v59, %s3329_s6 }
  0x79   : > { %952 = vrot.lane.b32.xlu0 %v851_v40, %s3329_s6 }
  0x7b   : > { %1002 = vrot.lane.b32.xlu1 %v3609_v60, %s3327_s29 }
  0x7d   : > { %1000 = vrot.lane.b32.xlu0 %v3582_v32, %s3327_s29 }
  0x7f   : > { %1415 = vrot.lane.b32.xlu1 %v1383_v53, %s3329_s6  ;;  %v891_v53 = vshll.u32 %v3657_v47, 16 }
  0x81   : > { %1044 = vrot.lane.b32.xlu0 %v863_v59, %s3328_s30  ;;  %v893_v59 = vrot.slane %v891_v53, 1  ;;  %v1391_v53 = vshrl.u32 %v3665_v54, 16 }
  0x83   : > { %1417 = vrot.lane.b32.xlu1 %v1385_v12, %s3329_s6  ;;  %v894_v5 = vor.u32 %v893_v59, %v889_v58  ;;  %v910_v58 = vrot.slane %v908_v31, 1 }
  0x85   : > { %1046 = vrot.lane.b32.xlu0 %v875_v20, %s3328_s30  ;;  %v899_v22 = vsel %vm743_vm3, %v894_v5, %v898_v8 }
  0x87   : > { %1465 = vrot.lane.b32.xlu1 %v3615_v1, %s3327_s29 }
  0x89   : > { %1463 = vrot.lane.b32.xlu0 %v3591_v38, %s3327_s29  ;;  %v3648_v36 = vpop.permute.xlu1 %1449 }
  0x8a   : > { %v1448_v40 = vpop.permute.xlu0 %1447 }
  0x8b   : > { %1499 = vrot.lane.b32.xlu1 %v1387_v33, %s3328_s30 }
  0x8d   : > { %1497 = vrot.lane.b32.xlu0 %v1385_v12, %s3328_s30  ;;  %v3653_v46 = vpop.permute.xlu1 %984  ;;  %v903_v12 = vshll.u32 %v3676_v2, 16 }
  0x8e   : > { %v3659_v51 = vpop.permute.xlu0 %1481 }
  0x8f   : > { %958 = vrot.lane.b32.xlu1 %v887_v42, %s3329_s6  ;;  %v905_v30 = vrot.slane %v903_v12, 1  ;;  %v650_v12 = vshll.u32 %v3298_v37, 16 }
  0x91   : > { %956 = vrot.lane.b32.xlu0 %v875_v20, %s3329_s6  ;;  %v987_v55 = vpop.permute.xlu1 %986  ;;  %v640_v20 = vshrl.u32 %v3297_v3, 16  ;;  %v906_v56 = vor.u32 %v905_v30, %v901_v28 }
  0x93   : > { %v939_v62 = vpop.permute.xlu0 %938  ;;  %1006 = vrot.lane.b32.xlu1 %v3657_v47, %s3327_s29  ;;  %v642_v34 = vrot.slane %v640_v20, 7  ;;  %v911_v5 = vsel %vm743_vm3, %v906_v56, %v910_v58 }
  0x94   : > { %v1064_v23 = vsel %vm1060_vm4, %v3416_v24, %v939_v62 }
  0x95   : > { %1004 = vrot.lane.b32.xlu0 %v3626_v7, %s3327_s29  ;;  %v1402_v0 = vpop.permute.xlu1 %1401  ;;  %v1097_v24 = vsel %vm1093_vm5, %v1064_v23, %v987_v55  ;;  %v645_v55 = vor.u32 %v643_v35, %v642_v34  ;;  %v3736_v23 = vsel %vm3395_vm2, %v642_v34, 0 }
  0x96   : > { %v920_v34 = vshll.u32 %v3736_v23, 16 }
  0x97   : > { %v1029_v10 = vpop.permute.xlu0 %1028  ;;  %1419 = vrot.lane.b32.xlu1 %v1387_v33, %s3329_s6  ;;  %v3732_v20 = vsel %vm3395_vm2, 0, %v645_v55 }
  0x98   : > { %v915_v30 = vshll.u32 %v3732_v20, 16 }
  0x99   : > { %1048 = vrot.lane.b32.xlu0 %v887_v42, %s3328_s30  ;;  %v1400_v13 = vpop.permute.xlu1 %1399  ;;  %v1516_v42 = vsel %vm1060_vm4, %v3408_v17, %v1402_v0 }
  0x9a   : > { %v1514_v39 = vsel %vm1060_vm4, %v3440_v43, %v1400_v13  ;;  %v1548_v62 = vsel %vm1093_vm5, %v1516_v42, %v3648_v36 }
  0x9b   : > { %v1031_v27 = vpop.permute.xlu0 %1030  ;;  %1421 = vrot.lane.b32.xlu1 %v1389_v11, %s3329_s6  ;;  %v1546_v59 = vsel %vm1093_vm5, %v1514_v39, %v1448_v40  ;;  %v913_v39 = vshrl.u32 %v3732_v20, 16 }
  0x9c   : > { %v3707_v49 = vsel %vm1126_vm6, %v1097_v24, %v1031_v27  ;;  %v1578_v8 = vsel %vm1126_vm6, %v1546_v59, %v3659_v51  ;;  %v917_v59 = vrot.slane %v915_v30, 1 }
  0x9d   : > { %1050 = vrot.lane.b32.xlu0 %v899_v22, %s3328_s30  ;;  %v1484_v33 = vpop.permute.xlu1 %1483  ;;  %v1621_v17 = vshll.u32 %v3707_v49, 16 }
  0x9e   : > { %v1580_v0 = vsel %vm1126_vm6, %v1548_v62, %v1484_v33  ;;  %v1619_v33 = vshrl.u32 %v3707_v49, 16 }
  0x9f   : > { %v941_v50 = vpop.permute.xlu0 %940  ;;  %1469 = vrot.lane.b32.xlu1 %v3665_v54, %s3327_s29  ;;  %v1623_v27 = vrot.slane %v1621_v17, 1  ;;  %v1625_v28 = vshll.u32 %v1580_v0, 16 }
  0xa0   : > { %v1066_v58 = vsel %vm1060_vm4, %v3420_v25, %v941_v50 }
  0xa1   : > { %1467 = vrot.lane.b32.xlu0 %v3635_v16, %s3327_s29  ;;  %v943_v43 = vpop.permute.xlu1 %942  ;;  %v1624_v42 = vor.u32 %v1623_v27, %v1619_v33  ;;  %v1627_v56 = vrot.slane %v1625_v28, 1  ;;  %v1393_v27 = vshrl.u32 %v3691_v18, 16 }
  0xa2   : > { %v1068_v62 = vsel %vm1060_vm4, %v3444_v44, %v943_v43  ;;  %v918_v43 = vor.u32 %v917_v59, %v913_v39  ;;  %v1395_v59 = vshrl.u32 %v3736_v23, 16 }
  0xa3   : > { %v937_v3 = vpop.permute.xlu0 %936  ;;  %1503 = vrot.lane.b32.xlu1 %v1391_v53, %s3328_s30  ;;  %v3771_v44 = vsel %vm743_vm3, %v1624_v42, %v1627_v56 }
  0xa4   : > { %v1062_v40 = vsel %vm1060_vm4, %v3435_v41, %v937_v3  ;;  %v649_v41 = vrot.slane %v647_v61, 7 }
  0xa5   : > { %1501 = vrot.lane.b32.xlu0 %v1389_v11, %s3328_s30  ;;  %v991_v36 = vpop.permute.xlu1 %990  ;;  %v1095_v13 = vsel %vm1093_vm5, %v1062_v40, %v3653_v46  ;;  %v1615_v46 = vshll.u32 %v1578_v8, 16  ;;  %v3299_v40 = vld [vmem:[%s3387_s25 + $0x78] sm:$0xff]   ;;  %v922_v8 = vrot.slane %v920_v34, 1  ;;  %s3049_s25 = sshll.u32 %s4771_s18, 9 }
  0xa6   : > { %v1128_v51 = vsel %vm1126_vm6, %v1095_v13, %v1029_v10  ;;  %v652_v24 = vor.u32 %v650_v12, %v649_v41  ;;  %v1101_v12 = vsel %vm1093_vm5, %v1068_v62, %v991_v36  ;;  %v654_v30 = vshrl.u32 %v3299_v40, 16  ;;  %s4261_s28 = scalar_lea.vmem %s4763_s5, %s3049_s25 }
  0xa7   : > { %3121 = vmatprep.mubr.msk.bf16.mxu0 %vm1173_vm7, %v1128_v51  ;;  %v1611_v11 = vshll.u32 %v1128_v51, 16  ;;  %v989_v31 = vpop.permute.xlu0 %988  ;;  %962 = vrot.lane.b32.xlu1 %v911_v5, %s3329_s6  ;;  %v1609_v35 = vshrl.u32 %v1128_v51, 16  ;;  %v657_v42 = vshll.u32 %v3299_v40, 16 }
  0xa8   : > { %3122 = vmatmul.mubr.msk.bf16.vlgmr.msra.gmra.mrb[0].mxu0 %vm1173_vm7, %v3707_v49  ;;  %v1099_v55 = vsel %vm1093_vm5, %v1066_v58, %v989_v31  ;;  %v3765_v3 = vsel %vm3395_vm2, 0, %v652_v24  ;;  %v923_v31 = vsel %vm743_vm3, %v918_v43, %v922_v8  ;;  %v656_v24 = vrot.slane %v654_v30, 7 }
  0xa9   : > { %v1613_v37 = vrot.slane %v1611_v11, 1  ;;  %960 = vrot.lane.b32.xlu0 %v899_v22, %s3329_s6  ;;  %v1404_v10 = vpop.permute.xlu1 %1403  ;;  %v1617_v22 = vrot.slane %v1615_v46, 1  ;;  %v927_v51 = vshll.u32 %v3765_v3, 16  ;;  %v925_v34 = vshrl.u32 %v3765_v3, 16 }
  0xaa   : > { %v1518_v56 = vsel %vm1060_vm4, %v3402_v15, %v1404_v10 }
  0xab   : > { %v1033_v61 = vpop.permute.xlu0 %1032  ;;  %1010 = vrot.lane.b32.xlu1 %v3732_v20, %s3327_s29  ;;  %v1614_v17 = vor.u32 %v1613_v37, %v1609_v35  ;;  %v929_v35 = vrot.slane %v927_v51, 1  ;;  %v416_v37 = vld [vmem:[%s377_s16 + $0x4] sm:$0xf] }
  0xac   : > { %v3756_v0 = vsel %vm1126_vm6, %v1099_v55, %v1033_v61 }
  0xad   : > { %1008 = vrot.lane.b32.xlu0 %v3676_v2, %s3327_s29  ;;  %3125 = vmatprep.mubr.msk.bf16.mxu0 %vm1173_vm7, %v3756_v0  ;;  %v1406_v25 = vpop.permute.xlu1 %1405  ;;  %v1618_v50 = vsel %vm743_vm3, %v1614_v17, %v1617_v22  ;;  %v1631_v46 = vshll.u32 %v3756_v0, 16  ;;  %v930_v43 = vor.u32 %v929_v35, %v925_v34  ;;  %v1629_v15 = vshrl.u32 %v3756_v0, 16 }
  0xae   : > { %3155 = vmatprep.mubr.msk.bf16.mxu1 %vm1173_vm7, %v1618_v50  ;;  %v1520_v11 = vsel %vm1060_vm4, %v3449_v45, %v1406_v25  ;;  %v418_v25 = vmul.bf16 0.0, %v416_v37 }
  0xaf   : > { %3156 = vmatmul.mubr.msk.bf16.vlgmr.msra.gmra.mrb[0].mxu1 %vm1173_vm7, %v3771_v44  ;;  %v1035_v13 = vpop.permute.xlu0 %1034  ;;  %1423 = vrot.lane.b32.xlu1 %v1391_v53, %s3329_s6  ;;  %v3793_v53 = vsel %vm3395_vm2, %v649_v41, 0  ;;  %v1633_v61 = vrot.slane %v1631_v46, 1 }
  0xb0   : > { %v3781_v28 = vsel %vm1126_vm6, %v1101_v12, %v1035_v13  ;;  %3222 = vmatpush3.bf16.msra.mxu1 %v3682_v4  ;;  %v415_v4 = vld [vmem:[%s377_s16] sm:$0xf]  ;;  %v932_v41 = vshll.u32 %v3793_v53, 16  ;;  %v659_v13 = vor.u32 %v657_v42, %v656_v24 }
  0xb1   : > { %1052 = vrot.lane.b32.xlu0 %v911_v5, %s3328_s30  ;;  %3126 = vmatmul.mubr.msk.bf16.gmra.mrb[4].mxu0 %vm1173_vm7, %v3781_v28  ;;  %v1454_v36 = vpop.permute.xlu1 %1453  ;;  %v1641_v5 = vshll.u32 %v3781_v28, 16  ;;  %v417_v55 = vmul.bf16 0.0, %v415_v4  ;;  %v1639_v51 = vshrl.u32 %v3781_v28, 16  ;;  %v1634_v30 = vor.u32 %v1633_v61, %v1629_v15 }
  0xb2   : > { %v1552_v39 = vsel %vm1093_vm5, %v1520_v11, %v1454_v36  ;;  %v934_v8 = vrot.slane %v932_v41, 1  ;;  %v3825_v41 = vsel %vm3395_vm2, 0, %v659_v13 }
  0xb3   : > { %v1452_v33 = vpop.permute.xlu0 %1451  ;;  %1425 = vrot.lane.b32.xlu1 %v1393_v27, %s3329_s6  ;;  %v1643_v50 = vrot.slane %v1641_v5, 1 }
  0xb4   : > { %v1550_v17 = vsel %vm1093_vm5, %v1518_v56, %v1452_v33  ;;  %v2935_v33 = vcombine.low %v417_v55, %v418_v25  ;;  %v935_v5 = vsel %vm743_vm3, %v930_v43, %v934_v8  ;;  %v1017_v55 = vshrl.u32 %v3825_v41, 16 }
  0xb5   : > { %1054 = vrot.lane.b32.xlu0 %v923_v31, %s3328_s30  ;;  %v1488_v45 = vpop.permute.xlu1 %1487  ;;  %v1644_v4 = vor.u32 %v1643_v50, %v1639_v51 }
  0xb6   : > { %v1584_v58 = vsel %vm1126_vm6, %v1552_v39, %v1488_v45  ;;  %v1019_v39 = vshll.u32 %v3825_v41, 16  ;;  %v3838_v45 = vsel %vm3395_vm2, %v656_v24, 0  ;;  %v661_v42 = vshrl.u32 %v2935_v33, 16 }
  0xb7   : > { %v1645_v22 = vshll.u32 %v1584_v58, 16  ;;  %v1486_v62 = vpop.permute.xlu0 %1485  ;;  %1473 = vrot.lane.b32.xlu1 %v3736_v23, %s3327_s29  ;;  %v664_v25 = vshll.u32 %v2935_v33, 16 }
  0xb8   : > { %v1582_v40 = vsel %vm1126_vm6, %v1550_v17, %v1486_v62  ;;  %v1021_v61 = vrot.slane %v1019_v39, 1  ;;  %v1024_v17 = vshll.u32 %v3838_v45, 16  ;;  %v663_v24 = vrot.slane %v661_v42, 7 }
  0xb9   : > { %v1635_v10 = vshll.u32 %v1582_v40, 16  ;;  %1471 = vrot.lane.b32.xlu0 %v3691_v18, %s3327_s29  ;;  %v947_v12 = vpop.permute.xlu1 %946  ;;  %v1647_v36 = vrot.slane %v1645_v22, 1  ;;  %v1479_v39 = vshrl.u32 %v3838_v45, 16 }
  0xba   : > { %v1022_v43 = vor.u32 %v1021_v61, %v1017_v55  ;;  %v1026_v8 = vrot.slane %v1024_v17, 1  ;;  %v741_v17 = vsel %vm3395_vm2, %v663_v24, 0 }
  0xbb   : > { %v1637_v11 = vrot.slane %v1635_v10, 1  ;;  %v945_v46 = vpop.permute.xlu0 %944  ;;  %1507 = vrot.lane.b32.xlu1 %v1395_v59, %s3328_s30  ;;  %v3830_v37 = vsel %vm743_vm3, %v1644_v4, %v1647_v36 }
  0xbc   : > { %v1070_v58 = vsel %vm1060_vm4, %v3476_v9, %v945_v46  ;;  %v1072_v9 = vsel %vm1060_vm4, %v3494_v21, %v947_v12  ;;  %v1397_v21 = vshrl.u32 %v3793_v53, 16  ;;  %v666_v12 = vor.u32 %v664_v25, %v663_v24 }
  0xbd   : > { %1505 = vrot.lane.b32.xlu0 %v1393_v27, %s3328_s30  ;;  %v995_v34 = vpop.permute.xlu1 %994  ;;  %v3821_v35 = vsel %vm743_vm3, %v1634_v30, %v1637_v11  ;;  %v1027_v30 = vsel %vm743_vm3, %v1022_v43, %v1026_v8  ;;  %v2192_v8 = vshll.u32 %v741_v17, 16 }
  0xbe   : > { %3159 = vmatprep.mubr.msk.bf16.mxu1 %vm1173_vm7, %v3821_v35  ;;  %v1105_v15 = vsel %vm1093_vm5, %v1072_v9, %v995_v34  ;;  %v723_v46 = vsel %vm3395_vm2, 0, %v666_v12 }
  0xbf   : > { %3160 = vmatmul.mubr.msk.bf16.gmra.mrb[4].mxu1 %vm1173_vm7, %v3830_v37  ;;  %v993_v27 = vpop.permute.xlu0 %992  ;;  %966 = vrot.lane.b32.xlu1 %v935_v5, %s3329_s6 }
  0xc0   : > { %v1103_v22 = vsel %vm1093_vm5, %v1070_v58, %v993_v27  ;;  %v2187_v27 = vshll.u32 %v723_v46, 16 }
  0xc1   : > { %964 = vrot.lane.b32.xlu0 %v923_v31, %s3329_s6  ;;  %v1408_v56 = vpop.permute.xlu1 %1407  ;;  %v3301_v31 = vld [vmem:[%s4761_s3 + $0x10] sm:$0xff]  }
  0xc2   : > { %3187 = vmatprep.subr.bf16.mxu0 %v3301_v31  ;;  %v2189_v43 = vrot.slane %v2187_v27, 1  ;;  %v2381_v27 = vshrl.u32 %v741_v17, 16 }
  0xc3   : > { %v1037_v62 = vpop.permute.xlu0 %1036  ;;  %1014 = vrot.lane.b32.xlu1 %v3825_v41, %s3327_s29  ;;  %3188 = vmatpush3.bf16.msra.mxu0 %v3301_v31  ;;  %v2185_v31 = vshrl.u32 %v723_v46, 16 }
  0xc4   : > { %v3854_v50 = vsel %vm1126_vm6, %v1103_v22, %v1037_v62 }
  0xc5   : > { %1012 = vrot.lane.b32.xlu0 %v3765_v3, %s3327_s29  ;;  %3129 = vmatprep.mubr.msk.bf16.mxu0 %vm1173_vm7, %v3854_v50  ;;  %v1410_v40 = vpop.permute.xlu1 %1409 }
  0xc6   : > { %v1524_v36 = vsel %vm1060_vm4, %v3503_v29, %v1410_v40  ;;  %v1522_v29 = vsel %vm1060_vm4, %v3483_v14, %v1408_v56  ;;  %v1649_v14 = vshrl.u32 %v3854_v50, 16 }
  0xc7   : > { %v1039_v10 = vpop.permute.xlu0 %1038  ;;  %1427 = vrot.lane.b32.xlu1 %v1395_v59, %s3329_s6  ;;  %v1651_v59 = vshll.u32 %v3854_v50, 16 }
  0xc8   : > { %v3864_v13 = vsel %vm1126_vm6, %v1105_v15, %v1039_v10 }
  0xc9   : > { %1056 = vrot.lane.b32.xlu0 %v935_v5, %s3328_s30  ;;  %3130 = vmatmul.mubr.msk.bf16.gmra.mrb[8].mxu0 %vm1173_vm7, %v3864_v13  ;;  %v1458_v51 = vpop.permute.xlu1 %1457  ;;  %v1661_v33 = vshll.u32 %v3864_v13, 16  ;;  %v1653_v42 = vrot.slane %v1651_v59, 1  ;;  %v1659_v9 = vshrl.u32 %v3864_v13, 16  ;;  %v2190_v59 = vor.u32 %v2189_v43, %v2185_v31 }
  0xca   : > { %v1556_v4 = vsel %vm1093_vm5, %v1524_v36, %v1458_v51 }
  0xcb   : > { %v1456_v11 = vpop.permute.xlu0 %1455  ;;  %1429 = vrot.lane.b32.xlu1 %v1397_v21, %s3329_s6  ;;  %v1663_v22 = vrot.slane %v1661_v33, 1  ;;  %v1654_v15 = vor.u32 %v1653_v42, %v1649_v14 }
  0xcc   : > { %v1554_v58 = vsel %vm1093_vm5, %v1522_v29, %v1456_v11  ;;  %v2194_v11 = vrot.slane %v2192_v8, 1 }
  0xcd   : > { %1058 = vrot.lane.b32.xlu0 %v1027_v30, %s3328_s30  ;;  %v1492_v5 = vpop.permute.xlu1 %1491  ;;  %v1664_v24 = vor.u32 %v1663_v22, %v1659_v9 }
  0xce   : > { %v1588_v34 = vsel %vm1126_vm6, %v1556_v4, %v1492_v5  ;;  %v2195_v5 = vsel %vm743_vm3, %v2190_v59, %v2194_v11 }
  0xcf   : > { %v1665_v55 = vshll.u32 %v1588_v34, 16  ;;  %v1490_v61 = vpop.permute.xlu0 %1489  ;;  %1477 = vrot.lane.b32.xlu1 %v3838_v45, %s3327_s29 }
  0xd0   : > { %v1586_v62 = vsel %vm1126_vm6, %v1554_v58, %v1490_v61 }
  0xd1   : > { %v1655_v56 = vshll.u32 %v1586_v62, 16  ;;  %1475 = vrot.lane.b32.xlu0 %v3793_v53, %s3327_s29  ;;  %v951_v25 = vpop.permute.xlu1 %950  ;;  %v1667_v40 = vrot.slane %v1665_v55, 1 }
  0xd2   : > { %v1076_v42 = vsel %vm1060_vm4, %v3538_v57, %v951_v25 }
  0xd3   : > { %v1657_v10 = vrot.slane %v1655_v56, 1  ;;  %v949_v6 = vpop.permute.xlu0 %948  ;;  %1511 = vrot.lane.b32.xlu1 %v1479_v39, %s3328_s30  ;;  %v3901_v36 = vsel %vm743_vm3, %v1664_v24, %v1667_v40 }
  0xd5   : > { %1509 = vrot.lane.b32.xlu0 %v1397_v21, %s3328_s30  ;;  %v999_v12 = vpop.permute.xlu1 %998  ;;  %v3896_v51 = vsel %vm743_vm3, %v1654_v15, %v1657_v10  ;;  %v1074_v21 = vsel %vm1060_vm4, %v3521_v48, %v949_v6 }
  0xd6   : > { %3163 = vmatprep.mubr.msk.bf16.mxu1 %vm1173_vm7, %v3896_v51  ;;  %v1109_v48 = vsel %vm1093_vm5, %v1076_v42, %v999_v12 }
  0xd7   : > { %3164 = vmatmul.mubr.msk.bf16.gmra.mrb[8].mxu1 %vm1173_vm7, %v3901_v36  ;;  %v997_v33 = vpop.permute.xlu0 %996  ;;  %2182 = vrot.lane.b32.xlu1 %v723_v46, %s3327_s29 }
  0xd8   : > { %v1107_v29 = vsel %vm1093_vm5, %v1074_v21, %v997_v33 }
  0xd9   : > { %v1412_v4 = vpop.permute.xlu1 %1411  ;;  %2179 = vrot.lane.b32.xlu0 %v1027_v30, %s3329_s6 }
  0xda   : > { %v1526_v25 = vsel %vm1060_vm4, %v3527_v52, %v1412_v4 }
  0xdb   : > { %v1041_v34 = vpop.permute.xlu0 %1040  ;;  %2376 = vrot.lane.b32.xlu1 %v1479_v39, %s3329_s6 }
  0xdc   : > { %v3915_v58 = vsel %vm1126_vm6, %v1107_v29, %v1041_v34 }
  0xdd   : > { %3133 = vmatprep.mubr.msk.bf16.mxu0 %vm1173_vm7, %v3915_v58  ;;  %v1414_v30 = vpop.permute.xlu1 %1413  ;;  %2196 = vrot.lane.b32.xlu0 %v2195_v5, %s3328_s30  ;;  %v1671_v61 = vshll.u32 %v3915_v58, 16  ;;  %v1669_v15 = vshrl.u32 %v3915_v58, 16 }
  0xde   : > { %v1528_v55 = vsel %vm1060_vm4, %v3547_v63, %v1414_v30 }
  0xdf   : > { %v1043_v46 = vpop.permute.xlu0 %1042  ;;  %2383 = vrot.lane.b32.xlu1 %v2381_v27, %s3328_s30  ;;  %v1673_v9 = vrot.slane %v1671_v61, 1 }
  0xe0   : > { %v3923_v39 = vsel %vm1126_vm6, %v1109_v48, %v1043_v46 }
  0xe1   : > { %3134 = vmatmul.mubr.msk.bf16.gmra.mrb[12].mxu0 %vm1173_vm7, %v3923_v39  ;;  %v1462_v57 = vpop.permute.xlu1 %1461  ;;  %2379 = vrot.lane.b32.xlu0 %v741_v17, %s3327_s29  ;;  %v1681_v62 = vshll.u32 %v3923_v39, 16  ;;  %v1679_v24 = vshrl.u32 %v3923_v39, 16  ;;  %v1674_v59 = vor.u32 %v1673_v9, %v1669_v15 }
  0xe2   : > { %v1560_v14 = vsel %vm1093_vm5, %v1528_v55, %v1462_v57 }
  0xe3   : > { %v1460_v22 = vpop.permute.xlu0 %1459  ;;  %v1683_v8 = vrot.slane %v1681_v62, 1 }
  0xe4   : > { %v1558_v40 = vsel %vm1093_vm5, %v1526_v25, %v1460_v22 }
  0xe5   : > { %v1496_v56 = vpop.permute.xlu1 %1495  ;;  %v1684_v33 = vor.u32 %v1683_v8, %v1679_v24 }
  0xe6   : > { %v1592_v31 = vsel %vm1126_vm6, %v1560_v14, %v1496_v56 }
  0xe7   : > { %v1685_v17 = vshll.u32 %v1592_v31, 16  ;;  %v1494_v43 = vpop.permute.xlu0 %1493 }
  0xe8   : > { %v1590_v63 = vsel %vm1126_vm6, %v1558_v40, %v1494_v43 }
  0xe9   : > { %v1675_v10 = vshll.u32 %v1590_v63, 16  ;;  %v955_v6 = vpop.permute.xlu1 %954  ;;  %v1687_v12 = vrot.slane %v1685_v17, 1 }
  0xea   : > { %v1080_v48 = vsel %vm1060_vm4, %v3582_v32, %v955_v6 }
  0xeb   : > { %v1677_v11 = vrot.slane %v1675_v10, 1  ;;  %v953_v52 = vpop.permute.xlu0 %952  ;;  %v3946_v5 = vsel %vm743_vm3, %v1684_v33, %v1687_v12 }
  0xec   : > { %v1078_v27 = vsel %vm1060_vm4, %v3565_v19, %v953_v52 }
  0xed   : > { %v1003_v4 = vpop.permute.xlu1 %1002  ;;  %v3941_v21 = vsel %vm743_vm3, %v1674_v59, %v1677_v11 }
  0xee   : > { %3167 = vmatprep.mubr.msk.bf16.mxu1 %vm1173_vm7, %v3941_v21  ;;  %v1113_v55 = vsel %vm1093_vm5, %v1080_v48, %v1003_v4 }
  0xef   : > { %3168 = vmatmul.mubr.msk.bf16.gmra.mrb[12].mxu1 %vm1173_vm7, %v3946_v5  ;;  %v1001_v29 = vpop.permute.xlu0 %1000 }
  0xf0   : > { %v1111_v42 = vsel %vm1093_vm5, %v1078_v27, %v1001_v29 }
  0xf1   : > { %v1416_v34 = vpop.permute.xlu1 %1415 }
  0xf2   : > { %v1530_v9 = vsel %vm1060_vm4, %v3571_v26, %v1416_v34 }
  0xf3   : > { %v1045_v30 = vpop.permute.xlu0 %1044 }
  0xf4   : > { %v3956_v46 = vsel %vm1126_vm6, %v1111_v42, %v1045_v30 }
  0xf5   : > { %3137 = vmatprep.mubr.msk.bf16.mxu0 %vm1173_vm7, %v3956_v46  ;;  %v1418_v57 = vpop.permute.xlu1 %1417  ;;  %v1691_v62 = vshll.u32 %v3956_v46, 16  ;;  %v1689_v10 = vshrl.u32 %v3956_v46, 16 }
  0xf6   : > { %v1532_v32 = vsel %vm1060_vm4, %v3591_v38, %v1418_v57 }
  0xf7   : > { %v1047_v61 = vpop.permute.xlu0 %1046  ;;  %v1693_v17 = vrot.slane %v1691_v62, 1 }
  0xf8   : > { %v3962_v22 = vsel %vm1126_vm6, %v1113_v55, %v1047_v61 }
  0xf9   : > { %3138 = vmatmul.mubr.msk.bf16.gmra.mrb[16].mxu0 %vm1173_vm7, %v3962_v22  ;;  %v1466_v19 = vpop.permute.xlu1 %1465  ;;  %v1701_v56 = vshll.u32 %v3962_v22, 16  ;;  %v1699_v12 = vshrl.u32 %v3962_v22, 16  ;;  %v1694_v11 = vor.u32 %v1693_v17, %v1689_v10 }
  0xfa   : > { %v1564_v25 = vsel %vm1093_vm5, %v1532_v32, %v1466_v19 }
  0xfb   : > { %v1464_v14 = vpop.permute.xlu0 %1463  ;;  %v1703_v15 = vrot.slane %v1701_v56, 1 }
  0xfc   : > { %v1562_v43 = vsel %vm1093_vm5, %v1530_v9, %v1464_v14 }
  0xfd   : > { %v1500_v31 = vpop.permute.xlu1 %1499  ;;  %v1704_v33 = vor.u32 %v1703_v15, %v1699_v12 }
  0xfe   : > { %v1596_v40 = vsel %vm1126_vm6, %v1564_v25, %v1500_v31 }
  0xff   : > { %v1705_v8 = vshll.u32 %v1596_v40, 16  ;;  %v1498_v63 = vpop.permute.xlu0 %1497 }
 0x100   : > { %v1594_v38 = vsel %vm1126_vm6, %v1562_v43, %v1498_v63 }
 0x101   : > { %v1695_v6 = vshll.u32 %v1594_v38, 16  ;;  %v959_v24 = vpop.permute.xlu1 %958  ;;  %v1707_v59 = vrot.slane %v1705_v8, 1 }
 0x102   : > { %v1084_v55 = vsel %vm1060_vm4, %v3626_v7, %v959_v24 }
 0x103   : > { %v1697_v52 = vrot.slane %v1695_v6, 1  ;;  %v957_v26 = vpop.permute.xlu0 %956  ;;  %v3984_v34 = vsel %vm743_vm3, %v1704_v33, %v1707_v59 }
 0x104   : > { %v1082_v30 = vsel %vm1060_vm4, %v3609_v60, %v957_v26 }
 0x105   : > { %v1007_v4 = vpop.permute.xlu1 %1006  ;;  %v3979_v29 = vsel %vm743_vm3, %v1694_v11, %v1697_v52 }
 0x106   : > { %3171 = vmatprep.mubr.msk.bf16.mxu1 %vm1173_vm7, %v3979_v29  ;;  %v1117_v32 = vsel %vm1093_vm5, %v1084_v55, %v1007_v4 }
 0x107   : > { %3172 = vmatmul.mubr.msk.bf16.gmra.mrb[16].mxu1 %vm1173_vm7, %v3984_v34  ;;  %v1005_v27 = vpop.permute.xlu0 %1004 }
 0x108   : > { %v1115_v48 = vsel %vm1093_vm5, %v1082_v30, %v1005_v27 }
 0x109   : > { %v1420_v42 = vpop.permute.xlu1 %1419 }
 0x10a   : > { %v1534_v17 = vsel %vm1060_vm4, %v3615_v1, %v1420_v42 }
 0x10b   : > { %v1049_v57 = vpop.permute.xlu0 %1048 }
 0x10c   : > { %v3994_v61 = vsel %vm1126_vm6, %v1115_v48, %v1049_v57 }
 0x10d   : > { %3141 = vmatprep.mubr.msk.bf16.mxu0 %vm1173_vm7, %v3994_v61  ;;  %v1422_v19 = vpop.permute.xlu1 %1421  ;;  %v1711_v56 = vshll.u32 %v3994_v61, 16  ;;  %v1709_v6 = vshrl.u32 %v3994_v61, 16 }
 0x10e   : > { %v1536_v7 = vsel %vm1060_vm4, %v3635_v16, %v1422_v19 }
 0x10f   : > { %v1051_v62 = vpop.permute.xlu0 %1050  ;;  %v1713_v8 = vrot.slane %v1711_v56, 1 }
 0x110   : > { %v4000_v14 = vsel %vm1126_vm6, %v1117_v32, %v1051_v62 }
 0x111   : > { %3142 = vmatmul.mubr.msk.bf16.gmra.mrb[20].mxu0 %vm1173_vm7, %v4000_v14  ;;  %v1470_v60 = vpop.permute.xlu1 %1469  ;;  %v1721_v31 = vshll.u32 %v4000_v14, 16  ;;  %v1719_v59 = vshrl.u32 %v4000_v14, 16  ;;  %v1714_v52 = vor.u32 %v1713_v8, %v1709_v6 }
 0x112   : > { %v1568_v9 = vsel %vm1093_vm5, %v1536_v7, %v1470_v60 }
 0x113   : > { %v1468_v25 = vpop.permute.xlu0 %1467  ;;  %v1723_v10 = vrot.slane %v1721_v31, 1 }
 0x114   : > { %v1566_v63 = vsel %vm1093_vm5, %v1534_v17, %v1468_v25 }
 0x115   : > { %v1504_v40 = vpop.permute.xlu1 %1503  ;;  %v1724_v33 = vor.u32 %v1723_v10, %v1719_v59 }
 0x116   : > { %v1600_v43 = vsel %vm1126_vm6, %v1568_v9, %v1504_v40 }
 0x117   : > { %v1725_v15 = vshll.u32 %v1600_v43, 16  ;;  %v1502_v38 = vpop.permute.xlu0 %1501 }
 0x118   : > { %v1598_v16 = vsel %vm1126_vm6, %v1566_v63, %v1502_v38 }
 0x119   : > { %v1715_v24 = vshll.u32 %v1598_v16, 16  ;;  %v963_v12 = vpop.permute.xlu1 %962  ;;  %v1727_v11 = vrot.slane %v1725_v15, 1 }
 0x11a   : > { %v1088_v32 = vsel %vm1060_vm4, %v3676_v2, %v963_v12 }
 0x11b   : > { %v1717_v26 = vrot.slane %v1715_v24, 1  ;;  %v961_v1 = vpop.permute.xlu0 %960  ;;  %v4022_v42 = vsel %vm743_vm3, %v1724_v33, %v1727_v11 }
 0x11c   : > { %v1086_v57 = vsel %vm1060_vm4, %v3657_v47, %v961_v1 }
 0x11d   : > { %v1011_v4 = vpop.permute.xlu1 %1010  ;;  %v4017_v27 = vsel %vm743_vm3, %v1714_v52, %v1717_v26 }
 0x11e   : > { %3175 = vmatprep.mubr.msk.bf16.mxu1 %vm1173_vm7, %v4017_v27  ;;  %v1121_v7 = vsel %vm1093_vm5, %v1088_v32, %v1011_v4 }
 0x11f   : > { %3176 = vmatmul.mubr.msk.bf16.gmra.mrb[20].mxu1 %vm1173_vm7, %v4022_v42  ;;  %v1009_v30 = vpop.permute.xlu0 %1008 }
 0x120   : > { %v1119_v55 = vsel %vm1093_vm5, %v1086_v57, %v1009_v30 }
 0x121   : > { %v1424_v48 = vpop.permute.xlu1 %1423 }
 0x122   : > { %v1538_v8 = vsel %vm1060_vm4, %v3665_v54, %v1424_v48 }
 0x123   : > { %v1053_v19 = vpop.permute.xlu0 %1052 }
 0x124   : > { %v4032_v62 = vsel %vm1126_vm6, %v1119_v55, %v1053_v19 }
 0x125   : > { %3145 = vmatprep.mubr.msk.bf16.mxu0 %vm1173_vm7, %v4032_v62  ;;  %v1426_v60 = vpop.permute.xlu1 %1425  ;;  %v1731_v31 = vshll.u32 %v4032_v62, 16  ;;  %v1729_v24 = vshrl.u32 %v4032_v62, 16 }
 0x126   : > { %v1540_v2 = vsel %vm1060_vm4, %v3691_v18, %v1426_v60 }
 0x127   : > { %v1055_v56 = vpop.permute.xlu0 %1054  ;;  %v1733_v15 = vrot.slane %v1731_v31, 1 }
 0x128   : > { %v4038_v25 = vsel %vm1126_vm6, %v1121_v7, %v1055_v56 }
 0x129   : > { %3146 = vmatmul.mubr.msk.bf16.gmra.mrb[24].mxu0 %vm1173_vm7, %v4038_v25  ;;  %v1474_v47 = vpop.permute.xlu1 %1473  ;;  %v1741_v40 = vshll.u32 %v4038_v25, 16  ;;  %v1739_v11 = vshrl.u32 %v4038_v25, 16  ;;  %v1734_v26 = vor.u32 %v1733_v15, %v1729_v24 }
 0x12a   : > { %v1572_v17 = vsel %vm1093_vm5, %v1540_v2, %v1474_v47 }
 0x12b   : > { %v1472_v9 = vpop.permute.xlu0 %1471  ;;  %v1743_v6 = vrot.slane %v1741_v40, 1 }
 0x12c   : > { %v1570_v38 = vsel %vm1093_vm5, %v1538_v8, %v1472_v9 }
 0x12d   : > { %v1508_v43 = vpop.permute.xlu1 %1507  ;;  %v1744_v33 = vor.u32 %v1743_v6, %v1739_v11 }
 0x12e   : > { %v1604_v63 = vsel %vm1126_vm6, %v1572_v17, %v1508_v43 }
 0x12f   : > { %v1745_v10 = vshll.u32 %v1604_v63, 16  ;;  %v1506_v16 = vpop.permute.xlu0 %1505 }
 0x130   : > { %v1602_v18 = vsel %vm1126_vm6, %v1570_v38, %v1506_v16 }
 0x131   : > { %v1735_v12 = vshll.u32 %v1602_v18, 16  ;;  %v967_v59 = vpop.permute.xlu1 %966  ;;  %v1747_v52 = vrot.slane %v1745_v10, 1 }
 0x132   : > { %v1092_v7 = vsel %vm1060_vm4, %v3765_v3, %v967_v59 }
 0x133   : > { %v1737_v1 = vrot.slane %v1735_v12, 1  ;;  %v965_v54 = vpop.permute.xlu0 %964  ;;  %v4060_v48 = vsel %vm743_vm3, %v1744_v33, %v1747_v52 }
 0x134   : > { %v1090_v19 = vsel %vm1060_vm4, %v3732_v20, %v965_v54 }
 0x135   : > { %v1015_v4 = vpop.permute.xlu1 %1014  ;;  %v4055_v30 = vsel %vm743_vm3, %v1734_v26, %v1737_v1 }
 0x136   : > { %3179 = vmatprep.mubr.msk.bf16.mxu1 %vm1173_vm7, %v4055_v30  ;;  %v1125_v2 = vsel %vm1093_vm5, %v1092_v7, %v1015_v4 }
 0x137   : > { %3180 = vmatmul.mubr.msk.bf16.gmra.mrb[24].mxu1 %vm1173_vm7, %v4060_v48  ;;  %v1013_v57 = vpop.permute.xlu0 %1012 }
 0x138   : > { %v1123_v32 = vsel %vm1093_vm5, %v1090_v19, %v1013_v57 }
 0x139   : > { %v1428_v55 = vpop.permute.xlu1 %1427 }
 0x13a   : > { %v1542_v15 = vsel %vm1060_vm4, %v3736_v23, %v1428_v55 }
 0x13b   : > { %v1057_v60 = vpop.permute.xlu0 %1056 }
 0x13c   : > { %v1156_v56 = vsel %vm1126_vm6, %v1123_v32, %v1057_v60 }
 0x13d   : > { %3149 = vmatprep.mubr.msk.bf16.mxu0 %vm1173_vm7, %v1156_v56  ;;  %v1430_v47 = vpop.permute.xlu1 %1429  ;;  %v1751_v3 = vshll.u32 %v1156_v56, 16 }
 0x13e   : > { %v1544_v20 = vsel %vm1060_vm4, %v3793_v53, %v1430_v47 }
 0x13f   : > { %v1059_v31 = vpop.permute.xlu0 %1058  ;;  %v1753_v10 = vrot.slane %v1751_v3, 1 }
 0x140   : > { %v1158_v9 = vsel %vm1126_vm6, %v1125_v2, %v1059_v31 }
 0x141   : > { %3150 = vmatmul.mubr.msk.bf16.gmra.mrb[28].mxu0 %vm1173_vm7, %v1158_v9  ;;  %v1478_v40 = vpop.permute.xlu1 %1477  ;;  %v1761_v43 = vshll.u32 %v1158_v9, 16  ;;  %v1759_v59 = vshrl.u32 %v1158_v9, 16 }
 0x142   : > { %3189 = vmatprep.mubr.msk.bf16.mxu0 %vm1173_vm7, %v3707_v49  ;;  %v1576_v8 = vsel %vm1093_vm5, %v1544_v20, %v1478_v40  ;;  %v1749_v49 = vshrl.u32 %v1156_v56, 16 }
 0x143   : > { %v1476_v17 = vpop.permute.xlu0 %1475  ;;  %v1763_v53 = vrot.slane %v1761_v43, 1 }
 0x144   : > { %v1574_v16 = vsel %vm1093_vm5, %v1542_v15, %v1476_v17  ;;  %v1754_v23 = vor.u32 %v1753_v10, %v1749_v49 }
 0x145   : > { %v1512_v63 = vpop.permute.xlu1 %1511  ;;  %v1764_v26 = vor.u32 %v1763_v53, %v1759_v59 }
 0x146   : > { %v1608_v38 = vsel %vm1126_vm6, %v1576_v8, %v1512_v63 }
 0x147   : > { %v1765_v6 = vshll.u32 %v1608_v38, 16  ;;  %v1510_v18 = vpop.permute.xlu0 %1509 }
 0x148   : > { %v1606_v24 = vsel %vm1126_vm6, %v1574_v16, %v1510_v18 }
 0x149   : > { %v1755_v12 = vshll.u32 %v1606_v24, 16  ;;  %3190 = vmatmul.mubr.msk.bf16.vlgmr.msra.gmra.mrb[32].mxu0 %vm1173_vm7, %v3756_v0  ;;  %v1767_v11 = vrot.slane %v1765_v6, 1 }
 0x14a   : > { %3193 = vmatprep.mubr.msk.bf16.mxu0 %vm1173_vm7, %v3781_v28 }
 0x14b   : > { %v1757_v52 = vrot.slane %v1755_v12, 1  ;;  %v4094_v54 = vsel %vm743_vm3, %v1764_v26, %v1767_v11  ;;  %v2180_v0 = vpop.permute.xlu0 %2179 }
 0x14d   : > { %v4089_v1 = vsel %vm743_vm3, %v1754_v23, %v1757_v52 }
 0x14e   : > { %3183 = vmatprep.mubr.msk.bf16.mxu1 %vm1173_vm7, %v4089_v1 }
 0x14f   : > { %3184 = vmatmul.mubr.msk.bf16.gmra.mrb[28].mxu1 %vm1173_vm7, %v4094_v54  ;;  %v2197_v28 = vpop.permute.xlu0 %2196 }
 0x150   : > { %3223 = vmatprep.mubr.msk.bf16.mxu1 %vm1173_vm7, %v3771_v44  ;;  %v2183_v44 = vpop.permute.xlu1 %2182 }
 0x151   : > { %3194 = vmatmul.mubr.msk.bf16.gmra.mrb[36].mxu0 %vm1173_vm7, %v3854_v50 }
 0x152   : > { %3197 = vmatprep.mubr.msk.bf16.mxu0 %vm1173_vm7, %v3864_v13 }
 0x157   : > { %3224 = vmatmul.mubr.msk.bf16.vlgmr.msra.gmra.mrb[32].mxu1 %vm1173_vm7, %v3821_v35  ;;  %v2199_v35 = vsel %vm1060_vm4, %v3825_v41, %v2180_v0 }
 0x158   : > { %3227 = vmatprep.mubr.msk.bf16.mxu1 %vm1173_vm7, %v3830_v37  ;;  %v2377_v37 = vpop.permute.xlu1 %2376  ;;  %v2201_v50 = vsel %vm1093_vm5, %v2199_v35, %v2183_v44 }
 0x159   : > { %3198 = vmatmul.mubr.msk.bf16.gmra.mrb[40].mxu0 %vm1173_vm7, %v3915_v58 }
 0x15a   : > { %3201 = vmatprep.mubr.msk.bf16.mxu0 %vm1173_vm7, %v3923_v39  ;;  %v2380_v39 = vpop.permute.xlu0 %2379 }
 0x15f   : > { %3228 = vmatmul.mubr.msk.bf16.gmra.mrb[36].mxu1 %vm1173_vm7, %v3896_v51 }
 0x160   : > { %3231 = vmatprep.mubr.msk.bf16.mxu1 %vm1173_vm7, %v3901_v36  ;;  %v2386_v36 = vsel %vm1060_vm4, %v3838_v45, %v2377_v37  ;;  %v4165_v45 = vld [vmem:[%s4762_s4] ss:$0 sm:$0xff] }
 0x161   : > { %3202 = vmatmul.mubr.msk.bf16.gmra.mrb[44].mxu0 %vm1173_vm7, %v3956_v46  ;;  %v2384_v46 = vpop.permute.xlu1 %2383 }
 0x162   : > { %3205 = vmatprep.mubr.msk.bf16.mxu0 %vm1173_vm7, %v3962_v22 }
 0x167   : > { %3232 = vmatmul.mubr.msk.bf16.gmra.mrb[40].mxu1 %vm1173_vm7, %v3941_v21  ;;  %v2203_v21 = vsel %vm1126_vm6, %v2201_v50, %v2197_v28 }
 0x168   : > { %3235 = vmatprep.mubr.msk.bf16.mxu1 %vm1173_vm7, %v3946_v5  ;;  %v2388_v5 = vsel %vm1093_vm5, %v2386_v36, %v2380_v39  ;;  %v2393_v22 = vshll.u32 %v2203_v21, 16  ;;  %v2391_v4 = vshrl.u32 %v2203_v21, 16 }
 0x169   : > { %3206 = vmatmul.mubr.msk.bf16.gmra.mrb[48].mxu0 %vm1173_vm7, %v3994_v61 }
 0x16a   : > { %3209 = vmatprep.mubr.msk.bf16.mxu0 %vm1173_vm7, %v4000_v14 }
 0x16f   : > { %3236 = vmatmul.mubr.msk.bf16.gmra.mrb[44].mxu1 %vm1173_vm7, %v3979_v29 }
 0x170   : > { %3239 = vmatprep.mubr.msk.bf16.mxu1 %vm1173_vm7, %v3984_v34  ;;  %v2390_v34 = vsel %vm1126_vm6, %v2388_v5, %v2384_v46 }
 0x171   : > { %3210 = vmatmul.mubr.msk.bf16.gmra.mrb[52].mxu0 %vm1173_vm7, %v4032_v62 }
 0x172   : > { %3213 = vmatprep.mubr.msk.bf16.mxu0 %vm1173_vm7, %v4038_v25 }
 0x177   : > { %3240 = vmatmul.mubr.msk.bf16.gmra.mrb[48].mxu1 %vm1173_vm7, %v4017_v27 }
 0x178   : > { %3243 = vmatprep.mubr.msk.bf16.mxu1 %vm1173_vm7, %v4022_v42 }
 0x179   : > { %3214 = vmatmul.mubr.msk.bf16.gmra.mrb[56].mxu0 %vm1173_vm7, %v1156_v56 }
 0x17a   : > { %3217 = vmatprep.mubr.msk.bf16.mxu0 %vm1173_vm7, %v1158_v9 }
 0x17b   : > { %v4145_v13 = vpop.f32.mrb[0].mxu0 }
 0x17c   : > { %v4147_v51 = vpop.f32.mrb[1].mxu0 }
 0x17d   : > { %v4151_v58 = vpop.f32.mrb[2].mxu0 }
 0x17e   : > { %v4154_v41 = vpop.f32.mrb[3].mxu0 }
 0x17f   : > { %3244 = vmatmul.mubr.msk.bf16.gmra.mrb[52].mxu1 %vm1173_vm7, %v4055_v30  ;;  %v2395_v30 = vrot.slane %v2393_v22, 1 }
 0x180   : > { %3247 = vmatprep.mubr.msk.bf16.mxu1 %vm1173_vm7, %v4060_v48  ;;  %v2397_v48 = vshll.u32 %v2390_v34, 16 }
 0x181   : > { %3218 = vmatmul.mubr.msk.bf16.gmra.mrb[60].mxu0 %vm1173_vm7, %v2203_v21  ;;  %v2396_v60 = vor.u32 %v2395_v30, %v2391_v4 }
 0x182   : > { %v3157_v29 = vpop.f32.mrb[0].mxu1  ;;  %v2399_v7 = vrot.slane %v2397_v48, 1 }
 0x183   : > { %v1869_v61 = vadd.f32 %v3157_v29, %v4165_v45  ;;  %v1860_v14 = vpop.f32.mrb[1].mxu1 }
 0x184   : > { %v4169_v27 = vpop.f32.mrb[4].mxu0  ;;  %v3158_v42 = vpop.f32.mrb[2].mxu1  ;;  %v1861_v55 = vadd.f32 %v4165_v45, %v1860_v14  ;;  %v2400_v56 = vsel %vm743_vm3, %v2396_v60, %v2399_v7 }
 0x185   : > { %v1872_v62 = vadd.f32 %v3158_v42, %v4165_v45  ;;  %2023 = vrot.lane.b32.xlu0 %v1869_v61, %s3329_s6  ;;  %v4173_v25 = vpop.f32.mrb[5].mxu0  ;;  %v1863_v33 = vpop.f32.mrb[3].mxu1 }
 0x186   : > { %v4175_v57 = vpop.f32.mrb[6].mxu0  ;;  %v1864_v32 = vadd.f32 %v4165_v45, %v1863_v33 }
 0x187   : > { %2025 = vrot.lane.b32.xlu1 %v1872_v62, %s3329_s6  ;;  %v4179_v19 = vpop.f32.mrb[7].mxu0  ;;  %3248 = vmatmul.mubr.msk.bf16.gmra.mrb[56].mxu1 %vm1173_vm7, %v4089_v1 }
 0x188   : > { %3251 = vmatprep.mubr.msk.bf16.mxu1 %vm1173_vm7, %v4094_v54 }
 0x189   : > { %2019 = vrot.lane.b32.xlu0 %v1861_v55, %s3329_s6 }
 0x18b   : > { %2021 = vrot.lane.b32.xlu1 %v1864_v32, %s3329_s6 }
 0x18f   : > { %3252 = vmatmul.mubr.msk.bf16.gmra.mrb[60].mxu1 %vm1173_vm7, %v2400_v56  ;;  %v1249_v56 = vadd.f32 %v4145_v13, %v4165_v45  ;;  %v1241_v13 = vadd.f32 %v4165_v45, %v4147_v51 }
 0x192   : > { %v3161_v47 = vpop.f32.mrb[4].mxu1 }
 0x193   : > { %v1885_v2 = vadd.f32 %v3161_v47, %v4165_v45  ;;  %v1876_v31 = vpop.f32.mrb[5].mxu1 }
 0x194   : > { %v3162_v9 = vpop.f32.mrb[6].mxu1  ;;  %v1877_v3 = vadd.f32 %v4165_v45, %v1876_v31  ;;  %v1252_v31 = vadd.f32 %v4151_v58, %v4165_v45 }
 0x195   : > { %v1888_v40 = vadd.f32 %v3162_v9, %v4165_v45  ;;  %2031 = vrot.lane.b32.xlu0 %v1885_v2, %s3329_s6  ;;  %v1879_v20 = vpop.f32.mrb[7].mxu1 }
 0x196   : > { %v1880_v17 = vadd.f32 %v4165_v45, %v1879_v20 }
 0x197   : > { %2033 = vrot.lane.b32.xlu1 %v1888_v40, %s3329_s6 }
 0x199   : > { %2027 = vrot.lane.b32.xlu0 %v1877_v3, %s3329_s6 }
 0x19b   : > { %2029 = vrot.lane.b32.xlu1 %v1880_v17, %s3329_s6  ;;  %v1244_v17 = vadd.f32 %v4165_v45, %v4154_v41  ;;  %v1265_v41 = vadd.f32 %v4169_v27, %v4165_v45 }
 0x19c   : > { %v4198_v43 = vpop.f32.mrb[8].mxu0 }
 0x19d   : > { %v4200_v8 = vpop.f32.mrb[9].mxu0 }
 0x19e   : > { %v4202_v63 = vpop.f32.mrb[10].mxu0 }
 0x19f   : > { %v4204_v15 = vpop.f32.mrb[11].mxu0 }
 0x1aa   : > { %v3165_v38 = vpop.f32.mrb[8].mxu1 }
 0x1ab   : > { %v1901_v10 = vadd.f32 %v3165_v38, %v4165_v45  ;;  %v1892_v16 = vpop.f32.mrb[9].mxu1 }
 0x1ac   : > { %v3166_v6 = vpop.f32.mrb[10].mxu1  ;;  %v1893_v24 = vadd.f32 %v4165_v45, %v1892_v16 }
 0x1ad   : > { %v1904_v18 = vadd.f32 %v3166_v6, %v4165_v45  ;;  %2039 = vrot.lane.b32.xlu0 %v1901_v10, %s3329_s6  ;;  %v1895_v53 = vpop.f32.mrb[11].mxu1 }
 0x1ae   : > { %v1896_v49 = vadd.f32 %v4165_v45, %v1895_v53 }
 0x1af   : > { %2041 = vrot.lane.b32.xlu1 %v1904_v18, %s3329_s6 }
 0x1b1   : > { %2035 = vrot.lane.b32.xlu0 %v1893_v24, %s3329_s6 }
 0x1b3   : > { %2037 = vrot.lane.b32.xlu1 %v1896_v49, %s3329_s6  ;;  %v1268_v49 = vadd.f32 %v4175_v57, %v4165_v45  ;;  %v1260_v57 = vadd.f32 %v4165_v45, %v4179_v19 }
 0x1b4   : > { %v4214_v12 = vpop.f32.mrb[12].mxu0 }
 0x1b5   : > { %v4216_v59 = vpop.f32.mrb[13].mxu0 }
 0x1b6   : > { %v4218_v11 = vpop.f32.mrb[14].mxu0 }
 0x1b7   : > { %v4220_v23 = vpop.f32.mrb[15].mxu0 }
 0x1c2   : > { %v3169_v52 = vpop.f32.mrb[12].mxu1 }
 0x1c3   : > { %v1917_v26 = vadd.f32 %v3169_v52, %v4165_v45  ;;  %v1908_v1 = vpop.f32.mrb[13].mxu1 }
 0x1c4   : > { %v3170_v54 = vpop.f32.mrb[14].mxu1  ;;  %v1909_v28 = vadd.f32 %v4165_v45, %v1908_v1  ;;  %v1257_v1 = vadd.f32 %v4165_v45, %v4173_v25 }
 0x1c5   : > { %v1920_v0 = vadd.f32 %v3170_v54, %v4165_v45  ;;  %2047 = vrot.lane.b32.xlu0 %v1917_v26, %s3329_s6  ;;  %v1911_v44 = vpop.f32.mrb[15].mxu1 }
 0x1c6   : > { %v1912_v35 = vadd.f32 %v4165_v45, %v1911_v44 }
 0x1c7   : > { %2049 = vrot.lane.b32.xlu1 %v1920_v0, %s3329_s6 }
 0x1c9   : > { %2043 = vrot.lane.b32.xlu0 %v1909_v28, %s3329_s6 }
 0x1cb   : > { %2045 = vrot.lane.b32.xlu1 %v1912_v35, %s3329_s6 }
 0x1cc   : > { %v4230_v37 = vpop.f32.mrb[16].mxu0 }
 0x1cd   : > { %v4232_v50 = vpop.f32.mrb[17].mxu0 }
 0x1ce   : > { %v4234_v36 = vpop.f32.mrb[18].mxu0 }
 0x1cf   : > { %v4236_v39 = vpop.f32.mrb[19].mxu0 }
 0x1da   : > { %v3173_v21 = vpop.f32.mrb[16].mxu1 }
 0x1db   : > { %v1933_v5 = vadd.f32 %v3173_v21, %v4165_v45  ;;  %v1924_v46 = vpop.f32.mrb[17].mxu1 }
 0x1dc   : > { %v3174_v22 = vpop.f32.mrb[18].mxu1  ;;  %v1925_v61 = vadd.f32 %v4165_v45, %v1924_v46 }
 0x1dd   : > { %v1936_v29 = vadd.f32 %v3174_v22, %v4165_v45  ;;  %2055 = vrot.lane.b32.xlu0 %v1933_v5, %s3329_s6  ;;  %v1927_v34 = vpop.f32.mrb[19].mxu1 }
 0x1de   : > { %v1928_v14 = vadd.f32 %v4165_v45, %v1927_v34 }
 0x1df   : > { %2057 = vrot.lane.b32.xlu1 %v1936_v29, %s3329_s6 }
 0x1e1   : > { %2051 = vrot.lane.b32.xlu0 %v1925_v61, %s3329_s6 }
 0x1e3   : > { %2053 = vrot.lane.b32.xlu1 %v1928_v14, %s3329_s6 }
 0x1e4   : > { %v4246_v42 = vpop.f32.mrb[20].mxu0 }
 0x1e5   : > { %v4248_v62 = vpop.f32.mrb[21].mxu0 }
 0x1e6   : > { %v4250_v33 = vpop.f32.mrb[22].mxu0 }
 0x1e7   : > { %v4252_v4 = vpop.f32.mrb[23].mxu0 }
 0x1f2   : > { %v3177_v30 = vpop.f32.mrb[20].mxu1 }
 0x1f3   : > { %v1949_v48 = vadd.f32 %v3177_v30, %v4165_v45  ;;  %v1940_v55 = vpop.f32.mrb[21].mxu1 }
 0x1f4   : > { %v3178_v32 = vpop.f32.mrb[22].mxu1  ;;  %v1941_v47 = vadd.f32 %v4165_v45, %v1940_v55 }
 0x1f5   : > { %v1952_v60 = vadd.f32 %v3178_v32, %v4165_v45  ;;  %2063 = vrot.lane.b32.xlu0 %v1949_v48, %s3329_s6  ;;  %v1943_v7 = vpop.f32.mrb[23].mxu1  ;;  %v1281_v32 = vadd.f32 %v4198_v43, %v4165_v45 }
 0x1f6   : > { %v1944_v40 = vadd.f32 %v4165_v45, %v1943_v7 }
 0x1f7   : > { %2065 = vrot.lane.b32.xlu1 %v1952_v60, %s3329_s6  ;;  %v2024_v2 = vpop.permute.xlu0 %2023 }
 0x1f8   : > { %v2117_v9 = vsel %vm1060_vm4, %v1249_v56, %v2024_v2 }
 0x1f9   : > { %2149 = vst.msk [vmem:[%s4261_s28 + $0x20] sm:$0xff] %vm1093_vm5, %v2117_v9  ;;  %v2026_v20 = vpop.permute.xlu1 %2025  ;;  %2059 = vrot.lane.b32.xlu0 %v1941_v47, %s3329_s6  ;;  %v1284_v47 = vadd.f32 %v4202_v63, %v4165_v45  ;;  %v1273_v9 = vadd.f32 %v4165_v45, %v4200_v8  ;;  %v1276_v63 = vadd.f32 %v4165_v45, %v4204_v15 }
 0x1fa   : > { %v2118_v3 = vsel %vm1060_vm4, %v1252_v31, %v2026_v20 }
 0x1fb   : > { %2150 = vst.msk [vmem:[%s4261_s28 + $0x28] sm:$0xff] %vm1093_vm5, %v2118_v3  ;;  %2061 = vrot.lane.b32.xlu1 %v1944_v40, %s3329_s6  ;;  %v2020_v58 = vpop.permute.xlu0 %2019 }
 0x1fc   : > { %v2115_v38 = vsel %vm1060_vm4, %v1241_v13, %v2020_v58  ;;  %v4283_v10 = vpop.f32.mrb[24].mxu0 }
 0x1fd   : > { %2147 = vst.msk [vmem:[%s4261_s28] sm:$0xff] %vm1093_vm5, %v2115_v38  ;;  %v2022_v16 = vpop.permute.xlu1 %2021  ;;  %v4287_v51 = vpop.f32.mrb[25].mxu0 }
 0x1fe   : > { %v2116_v6 = vsel %vm1060_vm4, %v1244_v17, %v2022_v16  ;;  %v4290_v18 = vpop.f32.mrb[26].mxu0 }
 0x1ff   : > { %2148 = vst.msk [vmem:[%s4261_s28 + $0x8] sm:$0xff] %vm1093_vm5, %v2116_v6  ;;  %v4294_v53 = vpop.f32.mrb[27].mxu0 }
 0x207   : > { %v2032_v24 = vpop.permute.xlu0 %2031 }
 0x208   : > { %v2121_v52 = vsel %vm1060_vm4, %v1265_v41, %v2032_v24 }
 0x209   : > { %2153 = vst.msk [vmem:[%s4261_s28 + $0x60] sm:$0xff] %vm1093_vm5, %v2121_v52  ;;  %v2034_v26 = vpop.permute.xlu1 %2033 }
 0x20a   : > { %v2122_v54 = vsel %vm1060_vm4, %v1268_v49, %v2034_v26  ;;  %v3181_v0 = vpop.f32.mrb[24].mxu1 }
 0x20b   : > { %2154 = vst.msk [vmem:[%s4261_s28 + $0x68] sm:$0xff] %vm1093_vm5, %v2122_v54  ;;  %v1965_v27 = vadd.f32 %v3181_v0, %v4165_v45  ;;  %v1956_v44 = vpop.f32.mrb[25].mxu1  ;;  %v2028_v28 = vpop.permute.xlu0 %2027 }
 0x20c   : > { %v2119_v35 = vsel %vm1060_vm4, %v1257_v1, %v2028_v28  ;;  %v3182_v21 = vpop.f32.mrb[26].mxu1  ;;  %v1957_v29 = vadd.f32 %v4165_v45, %v1956_v44 }
 0x20d   : > { %2151 = vst.msk [vmem:[%s4261_s28 + $0x40] sm:$0xff] %vm1093_vm5, %v2119_v35  ;;  %v1968_v25 = vadd.f32 %v3182_v21, %v4165_v45  ;;  %v2030_v5 = vpop.permute.xlu1 %2029  ;;  %2071 = vrot.lane.b32.xlu0 %v1965_v27, %s3329_s6  ;;  %v1959_v46 = vpop.f32.mrb[27].mxu1 }
 0x20e   : > { %v2120_v22 = vsel %vm1060_vm4, %v1260_v57, %v2030_v5  ;;  %v1960_v19 = vadd.f32 %v4165_v45, %v1959_v46 }
 0x20f   : > { %2152 = vst.msk [vmem:[%s4261_s28 + $0x48] sm:$0xff] %vm1093_vm5, %v2120_v22  ;;  %2073 = vrot.lane.b32.xlu1 %v1968_v25, %s3329_s6 }
 0x211   : > { %2067 = vrot.lane.b32.xlu0 %v1957_v29, %s3329_s6 }
 0x213   : > { %2069 = vrot.lane.b32.xlu1 %v1960_v19, %s3329_s6 }
 0x214   : > { %v4324_v34 = vpop.f32.mrb[28].mxu0 }
 0x215   : > { %v4326_v61 = vpop.f32.mrb[29].mxu0 }
 0x216   : > { %v4328_v14 = vpop.f32.mrb[30].mxu0 }
 0x217   : > { %v4330_v30 = vpop.f32.mrb[31].mxu0 }
 0x21c   : > { %v4332_v48 = vpop.f32.mrb[32].mxu0 }
 0x21d   : > { %v4334_v55 = vpop.f32.mrb[33].mxu0 }
 0x21e   : > { %v4338_v60 = vpop.f32.mrb[34].mxu0 }
 0x21f   : > { %v4340_v7 = vpop.f32.mrb[35].mxu0  ;;  %v2040_v56 = vpop.permute.xlu0 %2039 }
 0x220   : > { %v2125_v2 = vsel %vm1060_vm4, %v1281_v32, %v2040_v56 }
 0x221   : > { %2157 = vst.msk [vmem:[%s4261_s28 + $0xa0] sm:$0xff] %vm1093_vm5, %v2125_v2  ;;  %v2042_v31 = vpop.permute.xlu1 %2041 }
 0x222   : > { %v2126_v40 = vsel %vm1060_vm4, %v1284_v47, %v2042_v31  ;;  %v3185_v43 = vpop.f32.mrb[28].mxu1 }
 0x223   : > { %2158 = vst.msk [vmem:[%s4261_s28 + $0xa8] sm:$0xff] %vm1093_vm5, %v2126_v40  ;;  %v1981_v20 = vadd.f32 %v3185_v43, %v4165_v45  ;;  %v1972_v13 = vpop.f32.mrb[29].mxu1  ;;  %v2036_v3 = vpop.permute.xlu0 %2035 }
 0x224   : > { %v2123_v58 = vsel %vm1060_vm4, %v1273_v9, %v2036_v3  ;;  %v3186_v17 = vpop.f32.mrb[30].mxu1  ;;  %v4356_v38 = vpop.f32.mrb[36].mxu0  ;;  %v1973_v15 = vadd.f32 %v4165_v45, %v1972_v13  ;;  %v1297_v9 = vadd.f32 %v4214_v12, %v4165_v45  ;;  %v1300_v3 = vadd.f32 %v4218_v11, %v4165_v45 }
 0x225   : > { %2155 = vst.msk [vmem:[%s4261_s28 + $0x80] sm:$0xff] %vm1093_vm5, %v2123_v58  ;;  %v1984_v8 = vadd.f32 %v3186_v17, %v4165_v45  ;;  %v2038_v16 = vpop.permute.xlu1 %2037  ;;  %v4361_v6 = vpop.f32.mrb[37].mxu0  ;;  %2079 = vrot.lane.b32.xlu0 %v1981_v20, %s3329_s6  ;;  %v1289_v17 = vadd.f32 %v4165_v45, %v4216_v59 }
 0x226   : > { %v2124_v41 = vsel %vm1060_vm4, %v1276_v63, %v2038_v16  ;;  %v1975_v24 = vpop.f32.mrb[31].mxu1  ;;  %v4365_v49 = vpop.f32.mrb[38].mxu0 }
 0x227   : > { %2156 = vst.msk [vmem:[%s4261_s28 + $0x88] sm:$0xff] %vm1093_vm5, %v2124_v41  ;;  %v4370_v52 = vpop.f32.mrb[39].mxu0  ;;  %2081 = vrot.lane.b32.xlu1 %v1984_v8, %s3329_s6  ;;  %v1976_v26 = vadd.f32 %v4165_v45, %v1975_v24 }
 0x229   : > { %2075 = vrot.lane.b32.xlu0 %v1973_v15, %s3329_s6  ;;  %v1292_v15 = vadd.f32 %v4165_v45, %v4220_v23 }
 0x22a   : > { %v3225_v1 = vpop.f32.mrb[32].mxu1 }
 0x22b   : > { %v2456_v54 = vadd.f32 %v3225_v1, %v4165_v45  ;;  %v2447_v0 = vpop.f32.mrb[33].mxu1  ;;  %2077 = vrot.lane.b32.xlu1 %v1976_v26, %s3329_s6 }
 0x22c   : > { %v4377_v27 = vpop.f32.mrb[40].mxu0  ;;  %v3226_v44 = vpop.f32.mrb[34].mxu1  ;;  %v2448_v25 = vadd.f32 %v4165_v45, %v2447_v0 }
 0x22d   : > { %v2459_v28 = vadd.f32 %v3226_v44, %v4165_v45  ;;  %v4380_v57 = vpop.f32.mrb[41].mxu0  ;;  %v2450_v35 = vpop.f32.mrb[35].mxu1  ;;  %2610 = vrot.lane.b32.xlu0 %v2456_v54, %s3329_s6 }
 0x22e   : > { %v4383_v21 = vpop.f32.mrb[42].mxu0  ;;  %v2451_v46 = vadd.f32 %v4165_v45, %v2450_v35 }
 0x22f   : > { %v4386_v5 = vpop.f32.mrb[43].mxu0  ;;  %2612 = vrot.lane.b32.xlu1 %v2459_v28, %s3329_s6 }
 0x231   : > { %2606 = vrot.lane.b32.xlu0 %v2448_v25, %s3329_s6 }
 0x232   : > { %v3229_v22 = vpop.f32.mrb[36].mxu1 }
 0x233   : > { %v2472_v29 = vadd.f32 %v3229_v22, %v4165_v45  ;;  %v2463_v19 = vpop.f32.mrb[37].mxu1  ;;  %2608 = vrot.lane.b32.xlu1 %v2451_v46, %s3329_s6 }
 0x234   : > { %v4393_v32 = vpop.f32.mrb[44].mxu0  ;;  %v3230_v56 = vpop.f32.mrb[38].mxu1  ;;  %v2464_v43 = vadd.f32 %v4165_v45, %v2463_v19 }
 0x235   : > { %v2475_v47 = vadd.f32 %v3230_v56, %v4165_v45  ;;  %v4396_v2 = vpop.f32.mrb[45].mxu0  ;;  %v2466_v31 = vpop.f32.mrb[39].mxu1  ;;  %2618 = vrot.lane.b32.xlu0 %v2472_v29, %s3329_s6 }
 0x236   : > { %v4401_v40 = vpop.f32.mrb[46].mxu0  ;;  %v2467_v58 = vadd.f32 %v4165_v45, %v2466_v31 }
 0x237   : > { %v4404_v20 = vpop.f32.mrb[47].mxu0  ;;  %2620 = vrot.lane.b32.xlu1 %v2475_v47, %s3329_s6  ;;  %v2048_v13 = vpop.permute.xlu0 %2047 }
 0x238   : > { %v2129_v63 = vsel %vm1060_vm4, %v1297_v9, %v2048_v13 }
 0x239   : > { %2161 = vst.msk [vmem:[%s4261_s28 + $0xe0] sm:$0xff] %vm1093_vm5, %v2129_v63  ;;  %v2050_v12 = vpop.permute.xlu1 %2049  ;;  %2614 = vrot.lane.b32.xlu0 %v2464_v43, %s3329_s6 }
 0x23a   : > { %v2130_v8 = vsel %vm1060_vm4, %v1300_v3, %v2050_v12  ;;  %v3233_v16 = vpop.f32.mrb[40].mxu1 }
 0x23b   : > { %2162 = vst.msk [vmem:[%s4261_s28 + $0xe8] sm:$0xff] %vm1093_vm5, %v2130_v8  ;;  %v2488_v11 = vadd.f32 %v3233_v16, %v4165_v45  ;;  %v2479_v41 = vpop.f32.mrb[41].mxu1  ;;  %2616 = vrot.lane.b32.xlu1 %v2467_v58, %s3329_s6  ;;  %v2044_v24 = vpop.permute.xlu0 %2043 }
 0x23c   : > { %v2127_v26 = vsel %vm1060_vm4, %v1289_v17, %v2044_v24  ;;  %v4424_v1 = vpop.f32.mrb[48].mxu0  ;;  %v3234_v59 = vpop.f32.mrb[42].mxu1  ;;  %v2480_v23 = vadd.f32 %v4165_v45, %v2479_v41 }
 0x23d   : > { %2159 = vst.msk [vmem:[%s4261_s28 + $0xc0] sm:$0xff] %vm1093_vm5, %v2127_v26  ;;  %v2491_v54 = vadd.f32 %v3234_v59, %v4165_v45  ;;  %v2046_v0 = vpop.permute.xlu1 %2045  ;;  %v4429_v44 = vpop.f32.mrb[49].mxu0  ;;  %2626 = vrot.lane.b32.xlu0 %v2488_v11, %s3329_s6  ;;  %v1313_v59 = vadd.f32 %v4230_v37, %v4165_v45 }
 0x23e   : > { %v2128_v28 = vsel %vm1060_vm4, %v1292_v15, %v2046_v0  ;;  %v2482_v35 = vpop.f32.mrb[43].mxu1  ;;  %v4433_v25 = vpop.f32.mrb[50].mxu0 }
 0x23f   : > { %2160 = vst.msk [vmem:[%s4261_s28 + $0xc8] sm:$0xff] %vm1093_vm5, %v2128_v28  ;;  %v4438_v46 = vpop.f32.mrb[51].mxu0  ;;  %2628 = vrot.lane.b32.xlu1 %v2491_v54, %s3329_s6  ;;  %v2483_v22 = vadd.f32 %v4165_v45, %v2482_v35 }
 0x241   : > { %2622 = vrot.lane.b32.xlu0 %v2480_v23, %s3329_s6  ;;  %v1316_v23 = vadd.f32 %v4234_v36, %v4165_v45 }
 0x242   : > { %v3237_v29 = vpop.f32.mrb[44].mxu1 }
 0x243   : > { %v2504_v19 = vadd.f32 %v3237_v29, %v4165_v45  ;;  %v2495_v56 = vpop.f32.mrb[45].mxu1  ;;  %2624 = vrot.lane.b32.xlu1 %v2483_v22, %s3329_s6 }
 0x244   : > { %v4445_v47 = vpop.f32.mrb[52].mxu0  ;;  %v3238_v31 = vpop.f32.mrb[46].mxu1  ;;  %v2496_v63 = vadd.f32 %v4165_v45, %v2495_v56 }
 0x245   : > { %v2507_v9 = vadd.f32 %v3238_v31, %v4165_v45  ;;  %v4448_v43 = vpop.f32.mrb[53].mxu0  ;;  %v2498_v13 = vpop.f32.mrb[47].mxu1  ;;  %2634 = vrot.lane.b32.xlu0 %v2504_v19, %s3329_s6  ;;  %v1305_v19 = vadd.f32 %v4165_v45, %v4232_v50 }
 0x246   : > { %v4451_v3 = vpop.f32.mrb[54].mxu0  ;;  %v2499_v12 = vadd.f32 %v4165_v45, %v2498_v13 }
 0x247   : > { %v4454_v58 = vpop.f32.mrb[55].mxu0  ;;  %2636 = vrot.lane.b32.xlu1 %v2507_v9, %s3329_s6 }
 0x249   : > { %2630 = vrot.lane.b32.xlu0 %v2496_v63, %s3329_s6  ;;  %v1308_v63 = vadd.f32 %v4165_v45, %v4236_v39 }
 0x24a   : > { %v3241_v17 = vpop.f32.mrb[48].mxu1 }
 0x24b   : > { %v2520_v8 = vadd.f32 %v3241_v17, %v4165_v45  ;;  %v2511_v16 = vpop.f32.mrb[49].mxu1  ;;  %2632 = vrot.lane.b32.xlu1 %v2499_v12, %s3329_s6 }
 0x24c   : > { %v4461_v11 = vpop.f32.mrb[56].mxu0  ;;  %v3242_v41 = vpop.f32.mrb[50].mxu1  ;;  %v2512_v0 = vadd.f32 %v4165_v45, %v2511_v16 }
 0x24d   : > { %v2523_v24 = vadd.f32 %v3242_v41, %v4165_v45  ;;  %v4464_v15 = vpop.f32.mrb[57].mxu0  ;;  %v2514_v26 = vpop.f32.mrb[51].mxu1  ;;  %2642 = vrot.lane.b32.xlu0 %v2520_v8, %s3329_s6 }
 0x24e   : > { %v4469_v54 = vpop.f32.mrb[58].mxu0  ;;  %v2515_v29 = vadd.f32 %v4165_v45, %v2514_v26 }
 0x24f   : > { %v4472_v28 = vpop.f32.mrb[59].mxu0  ;;  %2644 = vrot.lane.b32.xlu1 %v2523_v24, %s3329_s6  ;;  %v2056_v35 = vpop.permute.xlu0 %2055 }
 0x250   : > { %v2133_v22 = vsel %vm1060_vm4, %v1313_v59, %v2056_v35 }
 0x251   : > { %2165 = vst.msk [vmem:[%s4261_s28 + $0x120] sm:$0xff] %vm1093_vm5, %v2133_v22  ;;  %v2058_v37 = vpop.permute.xlu1 %2057  ;;  %2638 = vrot.lane.b32.xlu0 %v2512_v0, %s3329_s6 }
 0x252   : > { %v2134_v56 = vsel %vm1060_vm4, %v1316_v23, %v2058_v37  ;;  %v3245_v31 = vpop.f32.mrb[52].mxu1 }
 0x253   : > { %2166 = vst.msk [vmem:[%s4261_s28 + $0x128] sm:$0xff] %vm1093_vm5, %v2134_v56  ;;  %v2536_v36 = vadd.f32 %v3245_v31, %v4165_v45  ;;  %v2527_v9 = vpop.f32.mrb[53].mxu1  ;;  %2640 = vrot.lane.b32.xlu1 %v2515_v29, %s3329_s6  ;;  %v2052_v13 = vpop.permute.xlu0 %2051 }
 0x254   : > { %v2131_v12 = vsel %vm1060_vm4, %v1305_v19, %v2052_v13  ;;  %v4492_v17 = vpop.f32.mrb[60].mxu0  ;;  %v3246_v50 = vpop.f32.mrb[54].mxu1  ;;  %v2528_v59 = vadd.f32 %v4165_v45, %v2527_v9 }
 0x255   : > { %2163 = vst.msk [vmem:[%s4261_s28 + $0x100] sm:$0xff] %vm1093_vm5, %v2131_v12  ;;  %v2539_v8 = vadd.f32 %v3246_v50, %v4165_v45  ;;  %v2054_v16 = vpop.permute.xlu1 %2053  ;;  %v2530_v41 = vpop.f32.mrb[55].mxu1  ;;  %2650 = vrot.lane.b32.xlu0 %v2536_v36, %s3329_s6 }
 0x256   : > { %v2132_v24 = vsel %vm1060_vm4, %v1308_v63, %v2054_v16  ;;  %v4499_v26 = vpop.f32.mrb[61].mxu0  ;;  %v2531_v35 = vadd.f32 %v4165_v45, %v2530_v41 }
 0x257   : > { %2164 = vst.msk [vmem:[%s4261_s28 + $0x108] sm:$0xff] %vm1093_vm5, %v2132_v24  ;;  %v4504_v39 = vpop.f32.mrb[62].mxu0  ;;  %2652 = vrot.lane.b32.xlu1 %v2539_v8, %s3329_s6  ;;  %v1329_v8 = vadd.f32 %v4246_v42, %v4165_v45  ;;  %v1332_v24 = vadd.f32 %v4250_v33, %v4165_v45  ;;  %v1321_v42 = vadd.f32 %v4165_v45, %v4248_v62 }
 0x258   : > { %v4507_v0 = vpop.f32.mrb[63].mxu0 }
 0x259   : > { %2646 = vrot.lane.b32.xlu0 %v2528_v59, %s3329_s6 }
 0x25a   : > { %v3249_v23 = vpop.f32.mrb[56].mxu1 }
 0x25b   : > { %v2552_v22 = vadd.f32 %v3249_v23, %v4165_v45  ;;  %v2543_v29 = vpop.f32.mrb[57].mxu1  ;;  %2648 = vrot.lane.b32.xlu1 %v2531_v35, %s3329_s6 }
 0x25c   : > { %v3250_v37 = vpop.f32.mrb[58].mxu1  ;;  %v2544_v31 = vadd.f32 %v4165_v45, %v2543_v29 }
 0x25d   : > { %v2555_v19 = vadd.f32 %v3250_v37, %v4165_v45  ;;  %v2546_v56 = vpop.f32.mrb[59].mxu1  ;;  %2658 = vrot.lane.b32.xlu0 %v2552_v22, %s3329_s6  ;;  %v1324_v37 = vadd.f32 %v4165_v45, %v4252_v4  ;;  %v1348_v4 = vadd.f32 %v4290_v18, %v4165_v45 }
 0x25e   : > { %v2547_v36 = vadd.f32 %v4165_v45, %v2546_v56 }
 0x25f   : > { %2660 = vrot.lane.b32.xlu1 %v2555_v19, %s3329_s6 }
 0x261   : > { %2654 = vrot.lane.b32.xlu0 %v2544_v31, %s3329_s6  ;;  %v1345_v31 = vadd.f32 %v4283_v10, %v4165_v45  ;;  %v1340_v10 = vadd.f32 %v4165_v45, %v4294_v53 }
 0x262   : > { %v3253_v9 = vpop.f32.mrb[60].mxu1 }
 0x263   : > { %2656 = vrot.lane.b32.xlu1 %v2547_v36, %s3329_s6  ;;  %v2559_v13 = vpop.f32.mrb[61].mxu1  ;;  %v2568_v59 = vadd.f32 %v3253_v9, %v4165_v45 }
 0x264   : > { %v2560_v63 = vadd.f32 %v4165_v45, %v2559_v13  ;;  %v3254_v12 = vpop.f32.mrb[62].mxu1 }
 0x265   : > { %v2562_v50 = vpop.f32.mrb[63].mxu1  ;;  %v2571_v22 = vadd.f32 %v3254_v12, %v4165_v45 }
 0x266   : > { %v2563_v16 = vadd.f32 %v4165_v45, %v2562_v50  ;;  %2662 = vrot.lane.b32.xlu0 %v2560_v63, %s3329_s6  ;;  %v1337_v63 = vadd.f32 %v4165_v45, %v4287_v51  ;;  %v1361_v51 = vadd.f32 %v4324_v34, %v4165_v45 }
 0x267   : > { %v2064_v41 = vpop.permute.xlu0 %2063 }
 0x268   : > { %v2137_v35 = vsel %vm1060_vm4, %v1329_v8, %v2064_v41  ;;  %2664 = vrot.lane.b32.xlu1 %v2563_v16, %s3329_s6 }
 0x269   : > { %2169 = vst.msk [vmem:[%s4261_s28 + $0x160] sm:$0xff] %vm1093_vm5, %v2137_v35  ;;  %v2066_v23 = vpop.permute.xlu1 %2065  ;;  %v1353_v35 = vadd.f32 %v4165_v45, %v4326_v61 }
 0x26a   : > { %v2138_v29 = vsel %vm1060_vm4, %v1332_v24, %v2066_v23  ;;  %2666 = vrot.lane.b32.xlu0 %v2568_v59, %s3329_s6  ;;  %v1364_v24 = vadd.f32 %v4328_v14, %v4165_v45 }
 0x26b   : > { %2170 = vst.msk [vmem:[%s4261_s28 + $0x168] sm:$0xff] %vm1093_vm5, %v2138_v29  ;;  %v2060_v33 = vpop.permute.xlu0 %2059  ;;  %v2258_v29 = vadd.f32 %v4332_v48, %v4165_v45 }
 0x26c   : > { %v2135_v19 = vsel %vm1060_vm4, %v1321_v42, %v2060_v33  ;;  %2668 = vrot.lane.b32.xlu1 %v2571_v22, %s3329_s6  ;;  %v1356_v42 = vadd.f32 %v4165_v45, %v4330_v30 }
 0x26d   : > { %2167 = vst.msk [vmem:[%s4261_s28 + $0x140] sm:$0xff] %vm1093_vm5, %v2135_v19  ;;  %v2062_v62 = vpop.permute.xlu1 %2061 }
 0x26e   : > { %v2136_v56 = vsel %vm1060_vm4, %v1324_v37, %v2062_v62  ;;  %v2261_v37 = vadd.f32 %v4338_v60, %v4165_v45  ;;  %v2250_v62 = vadd.f32 %v4165_v45, %v4334_v55 }
 0x26f   : > { %2168 = vst.msk [vmem:[%s4261_s28 + $0x148] sm:$0xff] %vm1093_vm5, %v2136_v56 }
 0x27f   : > { %v2072_v36 = vpop.permute.xlu0 %2071 }
 0x280   : > { %v2141_v9 = vsel %vm1060_vm4, %v1345_v31, %v2072_v36  ;;  %v2253_v31 = vadd.f32 %v4165_v45, %v4340_v7 }
 0x281   : > { %2173 = vst.msk [vmem:[%s4261_s28 + $0x1a0] sm:$0xff] %vm1093_vm5, %v2141_v9  ;;  %v2074_v13 = vpop.permute.xlu1 %2073 }
 0x282   : > { %v2142_v12 = vsel %vm1060_vm4, %v1348_v4, %v2074_v13  ;;  %v2274_v4 = vadd.f32 %v4356_v38, %v4165_v45  ;;  %v2277_v13 = vadd.f32 %v4365_v49, %v4165_v45 }
 0x283   : > { %2174 = vst.msk [vmem:[%s4261_s28 + $0x1a8] sm:$0xff] %vm1093_vm5, %v2142_v12  ;;  %v2068_v50 = vpop.permute.xlu0 %2067  ;;  %v2266_v12 = vadd.f32 %v4165_v45, %v4361_v6 }
 0x284   : > { %v2139_v18 = vsel %vm1060_vm4, %v1337_v63, %v2068_v50 }
 0x285   : > { %2171 = vst.msk [vmem:[%s4261_s28 + $0x180] sm:$0xff] %vm1093_vm5, %v2139_v18  ;;  %v2070_v8 = vpop.permute.xlu1 %2069 }
 0x286   : > { %v2140_v16 = vsel %vm1060_vm4, %v1340_v10, %v2070_v8  ;;  %v2269_v10 = vadd.f32 %v4165_v45, %v4370_v52  ;;  %v2290_v8 = vadd.f32 %v4377_v27, %v4165_v45 }
 0x287   : > { %2172 = vst.msk [vmem:[%s4261_s28 + $0x188] sm:$0xff] %vm1093_vm5, %v2140_v16 }
 0x297   : > { %v2080_v41 = vpop.permute.xlu0 %2079 }
 0x298   : > { %v2145_v53 = vsel %vm1060_vm4, %v1361_v51, %v2080_v41  ;;  %v2293_v51 = vadd.f32 %v4383_v21, %v4165_v45 }
 0x299   : > { %2177 = vst.msk [vmem:[%s4261_s28 + $0x1e0] sm:$0xff] %vm1093_vm5, %v2145_v53  ;;  %v2082_v59 = vpop.permute.xlu1 %2081 }
 0x29a   : > { %v2146_v23 = vsel %vm1060_vm4, %v1364_v24, %v2082_v59  ;;  %v2282_v24 = vadd.f32 %v4165_v45, %v4380_v57  ;;  %v2285_v59 = vadd.f32 %v4165_v45, %v4386_v5 }
 0x29b   : > { %2178 = vst.msk [vmem:[%s4261_s28 + $0x1e8] sm:$0xff] %vm1093_vm5, %v2146_v23  ;;  %v2076_v34 = vpop.permute.xlu0 %2075  ;;  %v2306_v23 = vadd.f32 %v4393_v32, %v4165_v45 }
 0x29c   : > { %v2143_v14 = vsel %vm1060_vm4, %v1353_v35, %v2076_v34 }
 0x29d   : > { %2175 = vst.msk [vmem:[%s4261_s28 + $0x1c0] sm:$0xff] %vm1093_vm5, %v2143_v14  ;;  %v2078_v22 = vpop.permute.xlu1 %2077 }
 0x29e   : > { %v2144_v61 = vsel %vm1060_vm4, %v1356_v42, %v2078_v22  ;;  %v2309_v42 = vadd.f32 %v4401_v40, %v4165_v45  ;;  %v2298_v22 = vadd.f32 %v4165_v45, %v4396_v2 }
 0x29f   : > { %2176 = vst.msk [vmem:[%s4261_s28 + $0x1c8] sm:$0xff] %vm1093_vm5, %v2144_v61  ;;  %v2611_v33 = vpop.permute.xlu0 %2610  ;;  %v2301_v61 = vadd.f32 %v4165_v45, %v4404_v20 }
 0x2a0   : > { %v2704_v30 = vsel %vm1060_vm4, %v2258_v29, %v2611_v33 }
 0x2a1   : > { %3013 = vst.msk [vmem:[%s4261_s28 + $0x30] sm:$0xff] %vm1093_vm5, %v2704_v30  ;;  %v2613_v19 = vpop.permute.xlu1 %2612 }
 0x2a2   : > { %v2705_v48 = vsel %vm1060_vm4, %v2261_v37, %v2613_v19  ;;  %v2322_v37 = vadd.f32 %v4424_v1, %v4165_v45  ;;  %v2325_v19 = vadd.f32 %v4433_v25, %v4165_v45 }
 0x2a3   : > { %3014 = vst.msk [vmem:[%s4261_s28 + $0x38] sm:$0xff] %vm1093_vm5, %v2705_v48  ;;  %v2607_v56 = vpop.permute.xlu0 %2606  ;;  %v2314_v48 = vadd.f32 %v4165_v45, %v4429_v44 }
 0x2a4   : > { %v2702_v60 = vsel %vm1060_vm4, %v2250_v62, %v2607_v56 }
 0x2a5   : > { %3011 = vst.msk [vmem:[%s4261_s28 + $0x10] sm:$0xff] %vm1093_vm5, %v2702_v60  ;;  %v2609_v36 = vpop.permute.xlu1 %2608 }
 0x2a6   : > { %v2703_v55 = vsel %vm1060_vm4, %v2253_v31, %v2609_v36  ;;  %v2317_v31 = vadd.f32 %v4165_v45, %v4438_v46  ;;  %v2338_v36 = vadd.f32 %v4445_v47, %v4165_v45 }
 0x2a7   : > { %3012 = vst.msk [vmem:[%s4261_s28 + $0x18] sm:$0xff] %vm1093_vm5, %v2703_v55  ;;  %v2619_v9 = vpop.permute.xlu0 %2618  ;;  %v2341_v55 = vadd.f32 %v4451_v3, %v4165_v45 }
 0x2a8   : > { %v2708_v7 = vsel %vm1060_vm4, %v2274_v4, %v2619_v9 }
 0x2a9   : > { %3017 = vst.msk [vmem:[%s4261_s28 + $0x70] sm:$0xff] %vm1093_vm5, %v2708_v7  ;;  %v2621_v63 = vpop.permute.xlu1 %2620 }
 0x2aa   : > { %v2709_v38 = vsel %vm1060_vm4, %v2277_v13, %v2621_v63  ;;  %v2330_v13 = vadd.f32 %v4165_v45, %v4448_v43  ;;  %v2333_v63 = vadd.f32 %v4165_v45, %v4454_v58 }
 0x2ab   : > { %3018 = vst.msk [vmem:[%s4261_s28 + $0x78] sm:$0xff] %vm1093_vm5, %v2709_v38  ;;  %v2615_v50 = vpop.permute.xlu0 %2614  ;;  %v2354_v38 = vadd.f32 %v4461_v11, %v4165_v45 }
 0x2ac   : > { %v2706_v49 = vsel %vm1060_vm4, %v2266_v12, %v2615_v50 }
 0x2ad   : > { %3015 = vst.msk [vmem:[%s4261_s28 + $0x50] sm:$0xff] %vm1093_vm5, %v2706_v49  ;;  %v2617_v18 = vpop.permute.xlu1 %2616 }
 0x2ae   : > { %v2707_v6 = vsel %vm1060_vm4, %v2269_v10, %v2617_v18  ;;  %v2357_v10 = vadd.f32 %v4469_v54, %v4165_v45  ;;  %v2346_v18 = vadd.f32 %v4165_v45, %v4464_v15  ;;  %v2362_v15 = vadd.f32 %v4165_v45, %v4499_v26 }
 0x2af   : > { %3016 = vst.msk [vmem:[%s4261_s28 + $0x58] sm:$0xff] %vm1093_vm5, %v2707_v6  ;;  %v2627_v16 = vpop.permute.xlu0 %2626  ;;  %v2349_v6 = vadd.f32 %v4165_v45, %v4472_v28 }
 0x2b0   : > { %v2712_v52 = vsel %vm1060_vm4, %v2290_v8, %v2627_v16 }
 0x2b1   : > { %3021 = vst.msk [vmem:[%s4261_s28 + $0xb0] sm:$0xff] %vm1093_vm5, %v2712_v52  ;;  %v2629_v41 = vpop.permute.xlu1 %2628 }
 0x2b2   : > { %v2713_v27 = vsel %vm1060_vm4, %v2293_v51, %v2629_v41  ;;  %v2365_v41 = vadd.f32 %v4165_v45, %v4507_v0 }
 0x2b3   : > { %3022 = vst.msk [vmem:[%s4261_s28 + $0xb8] sm:$0xff] %vm1093_vm5, %v2713_v27  ;;  %v2623_v53 = vpop.permute.xlu0 %2622  ;;  %v3302_v27 = vld [vmem:[%s4762_s4] ss:$0 sm:$0xff] }
 0x2b4   : > { %v2710_v21 = vsel %vm1060_vm4, %v2282_v24, %v2623_v53  ;;  %v2370_v53 = vadd.f32 %v3302_v27, %v4492_v17 }
 0x2b5   : > { %3019 = vst.msk [vmem:[%s4261_s28 + $0x90] sm:$0xff] %vm1093_vm5, %v2710_v21  ;;  %v2625_v35 = vpop.permute.xlu1 %2624  ;;  %v2373_v21 = vadd.f32 %v3302_v27, %v4504_v39 }
 0x2b6   : > { %v2711_v57 = vsel %vm1060_vm4, %v2285_v59, %v2625_v35 }
 0x2b7   : > { %3020 = vst.msk [vmem:[%s4261_s28 + $0x98] sm:$0xff] %vm1093_vm5, %v2711_v57  ;;  %v2635_v34 = vpop.permute.xlu0 %2634 }
 0x2b8   : > { %v2716_v5 = vsel %vm1060_vm4, %v2306_v23, %v2635_v34 }
 0x2b9   : > { %3025 = vst.msk [vmem:[%s4261_s28 + $0xf0] sm:$0xff] %vm1093_vm5, %v2716_v5  ;;  %v2637_v14 = vpop.permute.xlu1 %2636 }
 0x2ba   : > { %v2717_v32 = vsel %vm1060_vm4, %v2309_v42, %v2637_v14 }
 0x2bb   : > { %3026 = vst.msk [vmem:[%s4261_s28 + $0xf8] sm:$0xff] %vm1093_vm5, %v2717_v32  ;;  %v2631_v29 = vpop.permute.xlu0 %2630 }
 0x2bc   : > { %v2714_v40 = vsel %vm1060_vm4, %v2298_v22, %v2631_v29 }
 0x2bd   : > { %3023 = vst.msk [vmem:[%s4261_s28 + $0xd0] sm:$0xff] %vm1093_vm5, %v2714_v40  ;;  %v2633_v33 = vpop.permute.xlu1 %2632 }
 0x2be   : > { %v2715_v2 = vsel %vm1060_vm4, %v2301_v61, %v2633_v33 }
 0x2bf   : > { %3024 = vst.msk [vmem:[%s4261_s28 + $0xd8] sm:$0xff] %vm1093_vm5, %v2715_v2  ;;  %v2643_v30 = vpop.permute.xlu0 %2642 }
 0x2c0   : > { %v2720_v20 = vsel %vm1060_vm4, %v2322_v37, %v2643_v30 }
 0x2c1   : > { %3029 = vst.msk [vmem:[%s4261_s28 + $0x130] sm:$0xff] %vm1093_vm5, %v2720_v20  ;;  %v2645_v62 = vpop.permute.xlu1 %2644 }
 0x2c2   : > { %v2721_v1 = vsel %vm1060_vm4, %v2325_v19, %v2645_v62 }
 0x2c3   : > { %3030 = vst.msk [vmem:[%s4261_s28 + $0x138] sm:$0xff] %vm1093_vm5, %v2721_v1  ;;  %v2639_v56 = vpop.permute.xlu0 %2638 }
 0x2c4   : > { %v2718_v25 = vsel %vm1060_vm4, %v2314_v48, %v2639_v56 }
 0x2c5   : > { %3027 = vst.msk [vmem:[%s4261_s28 + $0x110] sm:$0xff] %vm1093_vm5, %v2718_v25  ;;  %v2641_v60 = vpop.permute.xlu1 %2640 }
 0x2c6   : > { %v2719_v44 = vsel %vm1060_vm4, %v2317_v31, %v2641_v60 }
 0x2c7   : > { %3028 = vst.msk [vmem:[%s4261_s28 + $0x118] sm:$0xff] %vm1093_vm5, %v2719_v44  ;;  %v2651_v4 = vpop.permute.xlu0 %2650 }
 0x2c8   : > { %v2724_v46 = vsel %vm1060_vm4, %v2338_v36, %v2651_v4 }
 0x2c9   : > { %3033 = vst.msk [vmem:[%s4261_s28 + $0x170] sm:$0xff] %vm1093_vm5, %v2724_v46  ;;  %v2653_v9 = vpop.permute.xlu1 %2652 }
 0x2ca   : > { %v2725_v47 = vsel %vm1060_vm4, %v2341_v55, %v2653_v9 }
 0x2cb   : > { %3034 = vst.msk [vmem:[%s4261_s28 + $0x178] sm:$0xff] %vm1093_vm5, %v2725_v47  ;;  %v2647_v7 = vpop.permute.xlu0 %2646 }
 0x2cc   : > { %v2722_v3 = vsel %vm1060_vm4, %v2330_v13, %v2647_v7 }
 0x2cd   : > { %3031 = vst.msk [vmem:[%s4261_s28 + $0x150] sm:$0xff] %vm1093_vm5, %v2722_v3  ;;  %v2649_v12 = vpop.permute.xlu1 %2648 }
 0x2ce   : > { %v2723_v43 = vsel %vm1060_vm4, %v2333_v63, %v2649_v12 }
 0x2cf   : > { %3032 = vst.msk [vmem:[%s4261_s28 + $0x158] sm:$0xff] %vm1093_vm5, %v2723_v43  ;;  %v2659_v50 = vpop.permute.xlu0 %2658 }
 0x2d0   : > { %v2728_v58 = vsel %vm1060_vm4, %v2354_v38, %v2659_v50 }
 0x2d1   : > { %3037 = vst.msk [vmem:[%s4261_s28 + $0x1b0] sm:$0xff] %vm1093_vm5, %v2728_v58  ;;  %v2661_v49 = vpop.permute.xlu1 %2660 }
 0x2d2   : > { %v2729_v11 = vsel %vm1060_vm4, %v2357_v10, %v2661_v49 }
 0x2d3   : > { %3038 = vst.msk [vmem:[%s4261_s28 + $0x1b8] sm:$0xff] %vm1093_vm5, %v2729_v11  ;;  %v2655_v8 = vpop.permute.xlu0 %2654 }
 0x2d4   : > { %v2726_v54 = vsel %vm1060_vm4, %v2346_v18, %v2655_v8 }
 0x2d5   : > { %3035 = vst.msk [vmem:[%s4261_s28 + $0x190] sm:$0xff] %vm1093_vm5, %v2726_v54  ;;  %v2657_v16 = vpop.permute.xlu1 %2656 }
 0x2d6   : > { %v2727_v51 = vsel %vm1060_vm4, %v2349_v6, %v2657_v16 }
 0x2d7   : > { %3036 = vst.msk [vmem:[%s4261_s28 + $0x198] sm:$0xff] %vm1093_vm5, %v2727_v51 }
 0x2d8   : > { %v2663_v52 = vpop.permute.xlu0 %2662 }
 0x2d9   : > { %v2730_v28 = vsel %vm1060_vm4, %v2362_v15, %v2663_v52 }
 0x2da   : > { %3039 = vst.msk [vmem:[%s4261_s28 + $0x1d0] sm:$0xff] %vm1093_vm5, %v2730_v28  ;;  %v2665_v24 = vpop.permute.xlu1 %2664 }
 0x2db   : > { %v2731_v26 = vsel %vm1060_vm4, %v2365_v41, %v2665_v24 }
 0x2dc   : > { %3040 = vst.msk [vmem:[%s4261_s28 + $0x1d8] sm:$0xff] %vm1093_vm5, %v2731_v26  ;;  %v2667_v59 = vpop.permute.xlu0 %2666 }
 0x2dd   : > { %v2732_v45 = vsel %vm1060_vm4, %v2370_v53, %v2667_v59 }
 0x2de   : > { %3041 = vst.msk [vmem:[%s4261_s28 + $0x1f0] sm:$0xff] %vm1093_vm5, %v2732_v45  ;;  %v2669_v0 = vpop.permute.xlu1 %2668 }
 0x2df   : > { %v2733_v35 = vsel %vm1060_vm4, %v2373_v21, %v2669_v0 }
 0x2e0   : > { %3042 = vst.msk [vmem:[%s4261_s28 + $0x1f8] sm:$0xff] %vm1093_vm5, %v2733_v35 }
 0x2e1 PF: > { %s15_s20 = sadd.s32 1, %s3325_s20   ;;  %s4766_s18 = smov %s3321_s19 }
 0x2e2   : > { %p12_p5 = scmp.ge.s32.totalorder %s15_s20, 4   ;;  %s4767_s19 = smov %s4769_s21 }
 0x2e4   :  { %14 = sbr.rel (!%p12_p5) target bundleno = 2 (0x2), region = 80 }

</bundles_post_ra>
